<compile_context>
chip_gen: v7x
topology: tpu7x:2x2x1
jax: 0.10.0
libtpu: 0.0.40
codegen_flags: <defaults>
</compile_context>

<pallas_src>
import functools
import math

import jax
import jax.numpy as jnp
from jax.experimental import pallas as pl
from jax.experimental.pallas import tpu as pltpu

# ----------------------------- config (scaled-down bert-base-uncased) ------
VOCAB = 64
MAX_POS = 32
TYPE_VOCAB = 2
HIDDEN = 128          # bert-base uses 768; scaled for a small runnable demo
N_LAYERS = 2          # bert-base uses 12
N_HEADS = 4           # bert-base uses 12
HEAD_DIM = HIDDEN // N_HEADS
INTERMEDIATE = 512    # bert-base uses 3072
LN_EPS = 1e-12


def _default_vmem_limit():
    """Generation-keyed scoped-VMEM limit (3/4 of physical, capped at 100 MiB)."""
    cap = 64 * 1024 * 1024
    try:
        get_info = getattr(pltpu, "get_tpu_info", None)
        if get_info is not None:
            c = getattr(get_info(), "vmem_capacity_bytes", None)
            if c:
                cap = int(c)
    except Exception:
        pass
    return min((cap * 3) // 4, 100 * 1024 * 1024)


VMEM_LIMIT = _default_vmem_limit()
_BIG_VMEM = VMEM_LIMIT >= 64 * 1024 * 1024   # v5e / v6e (128 MiB) vs v7x (64 MiB)
TM_CAP = 512 if _BIG_VMEM else 256
TN_CAP = 2048 if _BIG_VMEM else 1024
TK_CAP = 1024


# ----------------------------- tiling helpers ------------------------------
def _pick_tile(dim, cap, step):
    """Largest divisor of `dim` that is <= cap and a multiple of `step`
    (or the full dim if dim <= cap -- full-extent blocks are always legal)."""
    if dim <= cap:
        return dim
    t = (cap // step) * step
    while t >= step:
        if dim % t == 0:
            return t
        t -= step
    return dim


def _gelu_tanh(y):
    # TODO(synk): HF BERT uses exact (erf) GELU; tanh approximation used here
    # for robust Mosaic lowering (goes to the EUP slot).
    c = math.sqrt(2.0 / math.pi)
    return 0.5 * y * (1.0 + jnp.tanh(c * (y + 0.044715 * y * y * y)))


# ----------------------------- GEMM kernels --------------------------------
def _matmul_1k_kernel(x_ref, w_ref, b_ref, o_ref, *, act, tn, n_n):
    """Single-k-step y = act(x @ w + b); weight/bias VMEM-resident, epilogue
    in-register (no accumulator scratch)."""
    if n_n == 1:
        w = w_ref[...]
        b = b_ref[...]
    else:
        col = pl.multiple_of(pl.program_id(1) * tn, 128)
        w = w_ref[:, pl.ds(col, tn)]
        b = b_ref[:, pl.ds(col, tn)]
    y = jnp.dot(x_ref[...], w, preferred_element_type=jnp.float32) + b
    if act == "gelu":
        y = _gelu_tanh(y)
    elif act == "tanh":
        y = jnp.tanh(y)
    o_ref[...] = y.astype(o_ref.dtype)


def _matmul_acc_kernel(x_ref, w_ref, b_ref, o_ref, acc_ref, *, act, n_k):
    """K-tiled fallback (K > TK_CAP): f32 VMEM accumulator, epilogue on last k."""
    @pl.when(pl.program_id(2) == 0)
    def _():
        acc_ref[...] = jnp.zeros_like(acc_ref)

    acc_ref[...] += jnp.dot(x_ref[...], w_ref[...],
                            preferred_element_type=jnp.float32)

    @pl.when(pl.program_id(2) == n_k - 1)
    def _():
        y = acc_ref[...] + b_ref[...]
        if act == "gelu":
            y = _gelu_tanh(y)
        elif act == "tanh":
            y = jnp.tanh(y)
        o_ref[...] = y.astype(o_ref.dtype)


def matmul_bias(x, w, b, act="none", out_dtype=jnp.bfloat16):
    """y = act(x @ w + b).  x:(M,K) bf16, w:(K,N) bf16, b:(N,) f32 -> (M,N)."""
    M, K = x.shape
    K2, N = w.shape
    assert K == K2
    tm = _pick_tile(M, TM_CAP, 16)
    tn = _pick_tile(N, TN_CAP, 128)
    tk = _pick_tile(K, TK_CAP, 128)
    n_k = K // tk
    b2 = b.reshape(1, N).astype(jnp.float32)

    if n_k == 1:
        n_n = N // tn
        return pl.pallas_call(
            functools.partial(_matmul_1k_kernel, act=act, tn=tn, n_n=n_n),
            out_shape=jax.ShapeDtypeStruct((M, N), out_dtype),
            grid=(M // tm, n_n),
            in_specs=[
                pl.BlockSpec((tm, K), lambda i, j: (i, 0)),
                pl.BlockSpec((K, N), lambda i, j: (0, 0)),   # resident weight
                pl.BlockSpec((1, N), lambda i, j: (0, 0)),   # resident bias
            ],
            out_specs=pl.BlockSpec((tm, tn), lambda i, j: (i, j)),
            compiler_params=pltpu.CompilerParams(
                dimension_semantics=("parallel", "parallel"),
                vmem_limit_bytes=VMEM_LIMIT),
        )(x, w, b2)

    # fallback: K-tiled with accumulator scratch
    return pl.pallas_call(
        functools.partial(_matmul_acc_kernel, act=act, n_k=n_k),
        out_shape=jax.ShapeDtypeStruct((M, N), out_dtype),
        grid=(M // tm, N // tn, n_k),
        in_specs=[
            pl.BlockSpec((tm, tk), lambda i, j, k: (i, k)),
            pl.BlockSpec((tk, tn), lambda i, j, k: (k, j)),
            pl.BlockSpec((1, tn), lambda i, j, k: (0, j)),
        ],
        out_specs=pl.BlockSpec((tm, tn), lambda i, j, k: (i, j)),
        scratch_shapes=[pltpu.VMEM((tm, tn), jnp.float32)],
        compiler_params=pltpu.CompilerParams(
            dimension_semantics=("parallel", "parallel", "arbitrary"),
            vmem_limit_bytes=VMEM_LIMIT),
    )(x, w, b2)


def _mm_res_ln_1k_kernel(x_ref, w_ref, b_ref, res_ref, g_ref, bt_ref, o_ref):
    """out = LayerNorm((x @ w + b) + res); single k step, no scratch."""
    h = jnp.dot(x_ref[...], w_ref[...], preferred_element_type=jnp.float32)
    h = h + b_ref[...] + res_ref[...].astype(jnp.float32)
    mu = jnp.mean(h, axis=-1, keepdims=True)
    var = jnp.mean(jnp.square(h - mu), axis=-1, keepdims=True)
    o_ref[...] = ((h - mu) * jax.lax.rsqrt(var + LN_EPS) * g_ref[...]
                  + bt_ref[...]).astype(o_ref.dtype)


def _mm_res_ln_acc_kernel(x_ref, w_ref, b_ref, res_ref, g_ref, bt_ref,
                          o_ref, acc_ref, *, n_k):
    """K-tiled fallback of the residual+LayerNorm GEMM."""
    @pl.when(pl.program_id(1) == 0)
    def _():
        acc_ref[...] = jnp.zeros_like(acc_ref)

    acc_ref[...] += jnp.dot(x_ref[...], w_ref[...],
                            preferred_element_type=jnp.float32)

    @pl.when(pl.program_id(1) == n_k - 1)
    def _():
        h = acc_ref[...] + b_ref[...] + res_ref[...].astype(jnp.float32)
        mu = jnp.mean(h, axis=-1, keepdims=True)
        var = jnp.mean(jnp.square(h - mu), axis=-1, keepdims=True)
        o_ref[...] = ((h - mu) * jax.lax.rsqrt(var + LN_EPS) * g_ref[...]
                      + bt_ref[...]).astype(o_ref.dtype)


def matmul_residual_layernorm(x, w, b, res, gamma, beta,
                              out_dtype=jnp.bfloat16):
    """LayerNorm(x @ w + b + res).  x:(M,K), w:(K,N), res:(M,N), N==HIDDEN."""
    M, K = x.shape
    K2, N = w.shape
    assert K == K2 and res.shape == (M, N)
    tm = _pick_tile(M, TM_CAP, 16)
    tk = _pick_tile(K, TK_CAP, 128)
    n_k = K // tk
    b2 = b.reshape(1, N).astype(jnp.float32)
    g2 = gamma.reshape(1, N).astype(jnp.float32)
    bt2 = beta.reshape(1, N).astype(jnp.float32)

    if n_k == 1:
        return pl.pallas_call(
            _mm_res_ln_1k_kernel,
            out_shape=jax.ShapeDtypeStruct((M, N), out_dtype),
            grid=(M // tm,),
            in_specs=[
                pl.BlockSpec((tm, K), lambda i: (i, 0)),
                pl.BlockSpec((K, N), lambda i: (0, 0)),    # resident weight
                pl.BlockSpec((1, N), lambda i: (0, 0)),
                pl.BlockSpec((tm, N), lambda i: (i, 0)),
                pl.BlockSpec((1, N), lambda i: (0, 0)),
                pl.BlockSpec((1, N), lambda i: (0, 0)),
            ],
            out_specs=pl.BlockSpec((tm, N), lambda i: (i, 0)),
            compiler_params=pltpu.CompilerParams(
                dimension_semantics=("parallel",),
                vmem_limit_bytes=VMEM_LIMIT),
        )(x, w, b2, res, g2, bt2)

    return pl.pallas_call(
        functools.partial(_mm_res_ln_acc_kernel, n_k=n_k),
        out_shape=jax.ShapeDtypeStruct((M, N), out_dtype),
        grid=(M // tm, n_k),
        in_specs=[
            pl.BlockSpec((tm, tk), lambda i, k: (i, k)),
            pl.BlockSpec((tk, N), lambda i, k: (k, 0)),
            pl.BlockSpec((1, N), lambda i, k: (0, 0)),
            pl.BlockSpec((tm, N), lambda i, k: (i, 0)),
            pl.BlockSpec((1, N), lambda i, k: (0, 0)),
            pl.BlockSpec((1, N), lambda i, k: (0, 0)),
        ],
        out_specs=pl.BlockSpec((tm, N), lambda i, k: (i, 0)),
        scratch_shapes=[pltpu.VMEM((tm, N), jnp.float32)],
        compiler_params=pltpu.CompilerParams(
            dimension_semantics=("parallel", "arbitrary"),
            vmem_limit_bytes=VMEM_LIMIT),
    )(x, w, b2, res, g2, bt2)


# ----------------------------- LayerNorm kernel ----------------------------
def _ln_kernel(x_ref, gamma_ref, beta_ref, o_ref):
    h = x_ref[...].astype(jnp.float32)
    mu = jnp.mean(h, axis=-1, keepdims=True)
    var = jnp.mean(jnp.square(h - mu), axis=-1, keepdims=True)
    o_ref[...] = ((h - mu) * jax.lax.rsqrt(var + LN_EPS) * gamma_ref[...]
                  + beta_ref[...]).astype(o_ref.dtype)


def layernorm(x, gamma, beta, out_dtype=jnp.bfloat16):
    """LayerNorm(x) over the last dim.  x:(M,H)."""
    M, H = x.shape
    tm = _pick_tile(M, TM_CAP, 16)
    return pl.pallas_call(
        _ln_kernel,
        out_shape=jax.ShapeDtypeStruct((M, H), out_dtype),
        grid=(M // tm,),
        in_specs=[
            pl.BlockSpec((tm, H), lambda i: (i, 0)),
            pl.BlockSpec((1, H), lambda i: (0, 0)),
            pl.BlockSpec((1, H), lambda i: (0, 0)),
        ],
        out_specs=pl.BlockSpec((tm, H), lambda i: (i, 0)),
        compiler_params=pltpu.CompilerParams(
            dimension_semantics=("parallel",),
            vmem_limit_bytes=VMEM_LIMIT),
    )(x,
      gamma.reshape(1, H).astype(jnp.float32),
      beta.reshape(1, H).astype(jnp.float32))


# ----------------------------- attention kernel ----------------------------
def _attn_kernel(q_ref, k_ref, v_ref, m_ref, o_ref, acc_ref, *, n_heads,
                 head_dim):
    """One (batch, query-tile) per grid step; heads via a static in-kernel loop.

    Q is already pre-scaled by 1/sqrt(head_dim) (folded into wqkv at init).
    q_ref: (1, tq, H) bf16; k_ref/v_ref: (1, S, H) bf16 slices of the fused
    QKV projection; m_ref: (1, 1, S) additive mask f32; o_ref: (1, tq, H)."""
    q = q_ref[0]                       # (tq, H) bf16 (pre-scaled)
    k = k_ref[0]                       # (S, H) bf16
    v = v_ref[0]
    bias = m_ref[0]                    # (1, S) f32, broadcast over query rows

    for h in range(n_heads):
        lo = h * head_dim
        qh = q[:, lo:lo + head_dim]
        kh = k[:, lo:lo + head_dim]
        vh = v[:, lo:lo + head_dim]
        # contract last dims directly (no explicit transpose of K)
        s = jax.lax.dot_general(qh, kh, (((1,), (1,)), ((), ())),
                                preferred_element_type=jnp.float32)
        s = s + bias
        s = s - jnp.max(s, axis=-1, keepdims=True)
        p = jnp.exp(s)
        denom = jnp.sum(p, axis=-1, keepdims=True)
        # normalize AFTER the PV matmul: (tq, head_dim) multiply, not (tq, S)
        ctx = jnp.dot(p.astype(vh.dtype), vh,
                      preferred_element_type=jnp.float32)
        acc_ref[:, lo:lo + head_dim] = ctx * pl.reciprocal(denom, approx=True)

    o_ref[0] = acc_ref[...].astype(o_ref.dtype)


def attention(qkv3, add_mask):
    """Scaled dot-product attention, one (batch, query-tile) per grid step.

    qkv3: (B, S, 3H) bf16 fused QKV projection;  add_mask: (B, 1, S) f32."""
    B, S, H3 = qkv3.shape
    H = H3 // 3
    tq = _pick_tile(S, 256, 16)
    return pl.pallas_call(
        functools.partial(_attn_kernel, n_heads=N_HEADS, head_dim=HEAD_DIM),
        out_shape=jax.ShapeDtypeStruct((B, S, H), jnp.bfloat16),
        grid=(B, S // tq),
        in_specs=[
            pl.BlockSpec((1, tq, H), lambda b, qi: (b, qi, 0)),   # Q tile
            pl.BlockSpec((1, S, H), lambda b, qi: (b, 0, 1)),     # K (full S)
            pl.BlockSpec((1, S, H), lambda b, qi: (b, 0, 2)),     # V (full S)
            pl.BlockSpec((1, 1, S), lambda b, qi: (b, 0, 0)),     # additive mask
        ],
        out_specs=pl.BlockSpec((1, tq, H), lambda b, qi: (b, qi, 0)),
        scratch_shapes=[pltpu.VMEM((tq, H), jnp.float32)],
        compiler_params=pltpu.CompilerParams(
            dimension_semantics=("parallel", "parallel"),
            vmem_limit_bytes=VMEM_LIMIT),
    )(qkv3, qkv3, qkv3, add_mask)


# ----------------------------- parameter init ------------------------------
def _dense_params(key, k_in, k_out):
    kw, _ = jax.random.split(key)
    w = jax.random.normal(kw, (k_in, k_out), jnp.float32) * 0.02
    b = jnp.zeros((k_out,), jnp.float32)
    return w, b


def init_params(key):
    keys = jax.random.split(key, 16)
    p = {}
    p["word_emb"] = jax.random.normal(keys[0], (VOCAB, HIDDEN), jnp.float32) * 0.02
    p["pos_emb"] = jax.random.normal(keys[1], (MAX_POS, HIDDEN), jnp.float32) * 0.02
    p["type_emb"] = jax.random.normal(keys[2], (TYPE_VOCAB, HIDDEN), jnp.float32) * 0.02
    p["emb_ln_g"] = jnp.ones((HIDDEN,), jnp.float32)
    p["emb_ln_b"] = jnp.zeros((HIDDEN,), jnp.float32)

    attn_scale = 1.0 / math.sqrt(HEAD_DIM)

    layers = []
    for li in range(N_LAYERS):
        lkeys = jax.random.split(keys[3 + li], 8)
        layer = {}
        wq, bq = _dense_params(lkeys[0], HIDDEN, HIDDEN)
        wk, bk = _dense_params(lkeys[1], HIDDEN, HIDDEN)
        wv, bv = _dense_params(lkeys[2], HIDDEN, HIDDEN)
        # fused QKV projection weight (H, 3H); 1/sqrt(head_dim) folded into the
        # Q slice so the attention kernel never scales the (S,S) score matrix.
        layer["wqkv"] = jnp.concatenate(
            [wq * attn_scale, wk, wv], axis=1).astype(jnp.bfloat16)
        layer["bqkv"] = jnp.concatenate([bq * attn_scale, bk, bv])
        wo, bo = _dense_params(lkeys[3], HIDDEN, HIDDEN)
        layer["wo"], layer["bo"] = wo.astype(jnp.bfloat16), bo
        layer["ln1_g"] = jnp.ones((HIDDEN,), jnp.float32)
        layer["ln1_b"] = jnp.zeros((HIDDEN,), jnp.float32)
        wi, bi = _dense_params(lkeys[4], HIDDEN, INTERMEDIATE)
        layer["wi"], layer["bi"] = wi.astype(jnp.bfloat16), bi
        wf, bf = _dense_params(lkeys[5], INTERMEDIATE, HIDDEN)
        layer["wf"], layer["bf"] = wf.astype(jnp.bfloat16), bf
        layer["ln2_g"] = jnp.ones((HIDDEN,), jnp.float32)
        layer["ln2_b"] = jnp.zeros((HIDDEN,), jnp.float32)
        layers.append(layer)
    p["layers"] = layers

    p["pool_w"], p["pool_b"] = _dense_params(keys[10], HIDDEN, HIDDEN)
    p["out_w"], p["out_b"] = _dense_params(keys[11], HIDDEN, 1)   # nn.Linear(H, 1)
    return p


# ----------------------------- model forward -------------------------------
def bert_base_uncased_forward(params, ids, mask, token_type_ids):
    B, S = ids.shape
    M = B * S

    # --- embeddings (gathers are glue; LN runs in a Pallas kernel) ---
    pos = jnp.arange(S, dtype=jnp.int32)
    emb = (params["word_emb"][ids]
           + params["pos_emb"][pos][None, :, :]
           + params["type_emb"][token_type_ids])
    emb2d = emb.reshape(M, HIDDEN).astype(jnp.float32)
    hidden = layernorm(emb2d, params["emb_ln_g"], params["emb_ln_b"])  # bf16 (M,H)

    # --- extended attention mask: (1 - mask) * -10000, additive, (B, 1, S) ---
    add_mask = ((1.0 - mask.astype(jnp.float32)) * -10000.0).reshape(B, 1, S)

    # --- encoder layers ---
    for layer in params["layers"]:
        # fused Q/K/V projection: (M, H) @ (H, 3H); Q pre-scaled at init
        qkv = matmul_bias(hidden, layer["wqkv"], layer["bqkv"])       # (M, 3H)
        qkv3 = qkv.reshape(B, S, 3 * HIDDEN)
        ctx = attention(qkv3, add_mask).reshape(M, HIDDEN)            # (M, H)
        # output projection with fused bias + residual + LayerNorm epilogue
        hidden = matmul_residual_layernorm(
            ctx, layer["wo"], layer["bo"], hidden,
            layer["ln1_g"], layer["ln1_b"])
        # FFN
        inter = matmul_bias(hidden, layer["wi"], layer["bi"], act="gelu")
        hidden = matmul_residual_layernorm(
            inter, layer["wf"], layer["bf"], hidden,
            layer["ln2_g"], layer["ln2_b"])

    # --- pooler: tanh(W @ hidden[:, 0] + b) and final Linear(H, 1).
    #     Tiny GEMVs (M=B, N=1) stay in plain JAX: a Pallas call here is pure
    #     launch/DMA overhead with masked (N<128) stores. ---
    cls = hidden.reshape(B, S, HIDDEN)[:, 0, :].astype(jnp.float32)   # (B, H)
    o2 = jnp.tanh(cls @ params["pool_w"] + params["pool_b"])
    # bert_drop (Dropout p=0.3) is identity at inference time
    bo = o2
    output = bo @ params["out_w"] + params["out_b"]                   # (B, 1)
    return output


# ----------------------------- main ----------------------------------------
if __name__ == "__main__":
    key = jax.random.PRNGKey(0)
    kp, kid = jax.random.split(key)

    params = init_params(kp)

    B, S = 2, 8
    ids = jax.random.randint(kid, (B, S), 0, VOCAB, dtype=jnp.int32)
    mask = jnp.ones((B, S), dtype=jnp.int32).at[1, 6:].set(0)        # some padding
    token_type_ids = jnp.zeros((B, S), dtype=jnp.int32)

    fwd = jax.jit(bert_base_uncased_forward)
    out = fwd(params, ids, mask, token_type_ids)
    out = jax.block_until_ready(out)
    assert out.shape == (B, 1) and out.dtype == jnp.float32
    print("KERNEL_OK")
</pallas_src>

<mosaic_0001>
module attributes {stable_mosaic.version = 11 : i64} {
  func.func @_ln_kernel(%arg0: i32, %arg1: memref<16x128xf32, #tpu.memory_space<vmem>>, %arg2: memref<1x128xf32, #tpu.memory_space<vmem>>, %arg3: memref<1x128xf32, #tpu.memory_space<vmem>>, %arg4: memref<16x128xbf16, #tpu.memory_space<vmem>>) attributes {dimension_semantics = [#tpu.dimension_semantics<parallel>], iteration_bounds = array<i64: 1>, scalar_prefetch = 0 : i64, scratch_operands = 0 : i64, tpu.core_type = #tpu.core_type<tc>, window_params = [{transform_indices = @transform_0, window_bounds = array<i64: 16, 128>}, {pipeline_mode = #tpu.pipeline_mode<synchronous>, transform_indices = @transform_1, window_bounds = array<i64: 1, 128>}, {pipeline_mode = #tpu.pipeline_mode<synchronous>, transform_indices = @transform_2, window_bounds = array<i64: 1, 128>}, {transform_indices = @transform_3, window_bounds = array<i64: 16, 128>}]} {
    %c0 = arith.constant 0 : index
    %c0_0 = arith.constant 0 : index
    %0 = vector.load %arg1[%c0, %c0_0] : memref<16x128xf32, #tpu.memory_space<vmem>>, vector<16x128xf32>
    %cst = arith.constant dense<0.000000e+00> : vector<16xf32>
    %1 = vector.multi_reduction <add>, %0, %cst [1] : vector<16x128xf32> to vector<16xf32>
    %2 = vector.shape_cast %1 : vector<16xf32> to vector<16x1xf32>
    %cst_1 = arith.constant 1.280000e+02 : f32
    %3 = vector.broadcast %cst_1 : f32 to vector<16x1xf32>
    %4 = arith.divf %2, %3 : vector<16x1xf32>
    %5 = vector.broadcast %4 : vector<16x1xf32> to vector<16x128xf32>
    %6 = arith.subf %0, %5 : vector<16x128xf32>
    %7 = arith.mulf %6, %6 : vector<16x128xf32>
    %cst_2 = arith.constant dense<0.000000e+00> : vector<16xf32>
    %8 = vector.multi_reduction <add>, %7, %cst_2 [1] : vector<16x128xf32> to vector<16xf32>
    %9 = vector.shape_cast %8 : vector<16xf32> to vector<16x1xf32>
    %cst_3 = arith.constant 1.280000e+02 : f32
    %10 = vector.broadcast %cst_3 : f32 to vector<16x1xf32>
    %11 = arith.divf %9, %10 : vector<16x1xf32>
    %12 = vector.broadcast %4 : vector<16x1xf32> to vector<16x128xf32>
    %13 = arith.subf %0, %12 : vector<16x128xf32>
    %cst_4 = arith.constant 9.99999996E-13 : f32
    %14 = vector.broadcast %cst_4 : f32 to vector<16x1xf32>
    %15 = arith.addf %11, %14 : vector<16x1xf32>
    %16 = math.rsqrt %15 : vector<16x1xf32>
    %17 = vector.broadcast %16 : vector<16x1xf32> to vector<16x128xf32>
    %18 = arith.mulf %13, %17 : vector<16x128xf32>
    %c0_5 = arith.constant 0 : index
    %c0_6 = arith.constant 0 : index
    %19 = vector.load %arg2[%c0_5, %c0_6] : memref<1x128xf32, #tpu.memory_space<vmem>>, vector<1x128xf32>
    %20 = vector.broadcast %19 : vector<1x128xf32> to vector<16x128xf32>
    %21 = arith.mulf %18, %20 : vector<16x128xf32>
    %c0_7 = arith.constant 0 : index
    %c0_8 = arith.constant 0 : index
    %22 = vector.load %arg3[%c0_7, %c0_8] : memref<1x128xf32, #tpu.memory_space<vmem>>, vector<1x128xf32>
    %23 = vector.broadcast %22 : vector<1x128xf32> to vector<16x128xf32>
    %24 = arith.addf %21, %23 : vector<16x128xf32>
    %25 = arith.truncf %24 : vector<16x128xf32> to vector<16x128xbf16>
    %c0_9 = arith.constant 0 : index
    %c0_10 = arith.constant 0 : index
    %26 = vector.load %arg4[%c0_9, %c0_10] : memref<16x128xbf16, #tpu.memory_space<vmem>>, vector<16x128xbf16>
    tpu.vector_store %arg4[%c0_9, %c0_10], %25 {strides = array<i32>} : memref<16x128xbf16, #tpu.memory_space<vmem>>, vector<16x128xbf16>,
    return
  }
  func.func @transform_0(%arg0: i32) -> (i32, i32) {
    %c0_i32 = arith.constant 0 : i32
    %c0_i32_0 = arith.constant 0 : i32
    return %arg0, %c0_i32 : i32, i32
  }
  func.func @transform_1(%arg0: i32) -> (i32, i32) {
    %c0_i32 = arith.constant 0 : i32
    %c0_i32_0 = arith.constant 0 : i32
    %c0_i32_1 = arith.constant 0 : i32
    return %c0_i32, %c0_i32_0 : i32, i32
  }
  func.func @transform_2(%arg0: i32) -> (i32, i32) {
    %c0_i32 = arith.constant 0 : i32
    %c0_i32_0 = arith.constant 0 : i32
    %c0_i32_1 = arith.constant 0 : i32
    return %c0_i32, %c0_i32_0 : i32, i32
  }
  func.func @transform_3(%arg0: i32) -> (i32, i32) {
    %c0_i32 = arith.constant 0 : i32
    %c0_i32_0 = arith.constant 0 : i32
    return %arg0, %c0_i32 : i32, i32
  }
}

module attributes {stable_mosaic.version = 11 : i64} {
  func.func @_matmul_1k_kernel(%arg0: i32, %arg1: i32, %arg2: memref<16x128xbf16, #tpu.memory_space<vmem>>, %arg3: memref<128x384xbf16, #tpu.memory_space<vmem>>, %arg4: memref<1x384xf32, #tpu.memory_space<vmem>>, %arg5: memref<16x384xbf16, #tpu.memory_space<vmem>>) attributes {dimension_semantics = [#tpu.dimension_semantics<parallel>, #tpu.dimension_semantics<parallel>], iteration_bounds = array<i64: 1, 1>, scalar_prefetch = 0 : i64, scratch_operands = 0 : i64, tpu.core_type = #tpu.core_type<tc>, window_params = [{transform_indices = @transform_0, window_bounds = array<i64: 16, 128>}, {pipeline_mode = #tpu.pipeline_mode<synchronous>, transform_indices = @transform_1, window_bounds = array<i64: 128, 384>}, {pipeline_mode = #tpu.pipeline_mode<synchronous>, transform_indices = @transform_2, window_bounds = array<i64: 1, 384>}, {transform_indices = @transform_3, window_bounds = array<i64: 16, 384>}]} {
    %c0 = arith.constant 0 : index
    %c0_0 = arith.constant 0 : index
    %0 = vector.load %arg3[%c0, %c0_0] : memref<128x384xbf16, #tpu.memory_space<vmem>>, vector<128x384xbf16>
    %c0_1 = arith.constant 0 : index
    %c0_2 = arith.constant 0 : index
    %1 = vector.load %arg4[%c0_1, %c0_2] : memref<1x384xf32, #tpu.memory_space<vmem>>, vector<1x384xf32>
    %c0_3 = arith.constant 0 : index
    %c0_4 = arith.constant 0 : index
    %2 = vector.load %arg2[%c0_3, %c0_4] : memref<16x128xbf16, #tpu.memory_space<vmem>>, vector<16x128xbf16>
    %cst = arith.constant dense<0.000000e+00> : vector<16x384xf32>
    %3 = tpu.matmul %2, %0, %cst {dimension_numbers = #tpu.dot_dimension_numbers<[1], [0], [0], [1], [0, 0, 1, 1], [], []>} : vector<16x128xbf16>, vector<128x384xbf16>, vector<16x384xf32> -> vector<16x384xf32>
    %4 = vector.broadcast %1 : vector<1x384xf32> to vector<16x384xf32>
    %5 = arith.addf %3, %4 : vector<16x384xf32>
    %6 = arith.truncf %5 : vector<16x384xf32> to vector<16x384xbf16>
    %c0_5 = arith.constant 0 : index
    %c0_6 = arith.constant 0 : index
    %7 = vector.load %arg5[%c0_5, %c0_6] : memref<16x384xbf16, #tpu.memory_space<vmem>>, vector<16x384xbf16>
    tpu.vector_store %arg5[%c0_5, %c0_6], %6 {strides = array<i32>} : memref<16x384xbf16, #tpu.memory_space<vmem>>, vector<16x384xbf16>,
    return
  }
  func.func @transform_0(%arg0: i32, %arg1: i32) -> (i32, i32) {
    %c0_i32 = arith.constant 0 : i32
    %c0_i32_0 = arith.constant 0 : i32
    return %arg0, %c0_i32 : i32, i32
  }
  func.func @transform_1(%arg0: i32, %arg1: i32) -> (i32, i32) {
    %c0_i32 = arith.constant 0 : i32
    %c0_i32_0 = arith.constant 0 : i32
    %c0_i32_1 = arith.constant 0 : i32
    return %c0_i32, %c0_i32_0 : i32, i32
  }
  func.func @transform_2(%arg0: i32, %arg1: i32) -> (i32, i32) {
    %c0_i32 = arith.constant 0 : i32
    %c0_i32_0 = arith.constant 0 : i32
    %c0_i32_1 = arith.constant 0 : i32
    return %c0_i32, %c0_i32_0 : i32, i32
  }
  func.func @transform_3(%arg0: i32, %arg1: i32) -> (i32, i32) {
    %c0_i32 = arith.constant 0 : i32
    return %arg0, %arg1 : i32, i32
  }
}

module attributes {stable_mosaic.version = 11 : i64} {
  func.func @_mm_res_ln_1k_kernel(%arg0: i32, %arg1: memref<16x128xbf16, #tpu.memory_space<vmem>>, %arg2: memref<128x128xbf16, #tpu.memory_space<vmem>>, %arg3: memref<1x128xf32, #tpu.memory_space<vmem>>, %arg4: memref<16x128xbf16, #tpu.memory_space<vmem>>, %arg5: memref<1x128xf32, #tpu.memory_space<vmem>>, %arg6: memref<1x128xf32, #tpu.memory_space<vmem>>, %arg7: memref<16x128xbf16, #tpu.memory_space<vmem>>) attributes {dimension_semantics = [#tpu.dimension_semantics<parallel>], iteration_bounds = array<i64: 1>, scalar_prefetch = 0 : i64, scratch_operands = 0 : i64, tpu.core_type = #tpu.core_type<tc>, window_params = [{transform_indices = @transform_0, window_bounds = array<i64: 16, 128>}, {pipeline_mode = #tpu.pipeline_mode<synchronous>, transform_indices = @transform_1, window_bounds = array<i64: 128, 128>}, {pipeline_mode = #tpu.pipeline_mode<synchronous>, transform_indices = @transform_2, window_bounds = array<i64: 1, 128>}, {transform_indices = @transform_3, window_bounds = array<i64: 16, 128>}, {pipeline_mode = #tpu.pipeline_mode<synchronous>, transform_indices = @transform_4, window_bounds = array<i64: 1, 128>}, {pipeline_mode = #tpu.pipeline_mode<synchronous>, transform_indices = @transform_5, window_bounds = array<i64: 1, 128>}, {transform_indices = @transform_6, window_bounds = array<i64: 16, 128>}]} {
    %c0 = arith.constant 0 : index
    %c0_0 = arith.constant 0 : index
    %0 = vector.load %arg1[%c0, %c0_0] : memref<16x128xbf16, #tpu.memory_space<vmem>>, vector<16x128xbf16>
    %c0_1 = arith.constant 0 : index
    %c0_2 = arith.constant 0 : index
    %1 = vector.load %arg2[%c0_1, %c0_2] : memref<128x128xbf16, #tpu.memory_space<vmem>>, vector<128x128xbf16>
    %cst = arith.constant dense<0.000000e+00> : vector<16x128xf32>
    %2 = tpu.matmul %0, %1, %cst {dimension_numbers = #tpu.dot_dimension_numbers<[1], [0], [0], [1], [0, 0, 1, 1], [], []>} : vector<16x128xbf16>, vector<128x128xbf16>, vector<16x128xf32> -> vector<16x128xf32>
    %c0_3 = arith.constant 0 : index
    %c0_4 = arith.constant 0 : index
    %3 = vector.load %arg3[%c0_3, %c0_4] : memref<1x128xf32, #tpu.memory_space<vmem>>, vector<1x128xf32>
    %4 = vector.broadcast %3 : vector<1x128xf32> to vector<16x128xf32>
    %5 = arith.addf %2, %4 : vector<16x128xf32>
    %c0_5 = arith.constant 0 : index
    %c0_6 = arith.constant 0 : index
    %6 = vector.load %arg4[%c0_5, %c0_6] : memref<16x128xbf16, #tpu.memory_space<vmem>>, vector<16x128xbf16>
    %7 = arith.extf %6 : vector<16x128xbf16> to vector<16x128xf32>
    %8 = arith.addf %5, %7 : vector<16x128xf32>
    %cst_7 = arith.constant dense<0.000000e+00> : vector<16xf32>
    %9 = vector.multi_reduction <add>, %8, %cst_7 [1] : vector<16x128xf32> to vector<16xf32>
    %10 = vector.shape_cast %9 : vector<16xf32> to vector<16x1xf32>
    %cst_8 = arith.constant 1.280000e+02 : f32
    %11 = vector.broadcast %cst_8 : f32 to vector<16x1xf32>
    %12 = arith.divf %10, %11 : vector<16x1xf32>
    %13 = vector.broadcast %12 : vector<16x1xf32> to vector<16x128xf32>
    %14 = arith.subf %8, %13 : vector<16x128xf32>
    %15 = arith.mulf %14, %14 : vector<16x128xf32>
    %cst_9 = arith.constant dense<0.000000e+00> : vector<16xf32>
    %16 = vector.multi_reduction <add>, %15, %cst_9 [1] : vector<16x128xf32> to vector<16xf32>
    %17 = vector.shape_cast %16 : vector<16xf32> to vector<16x1xf32>
    %cst_10 = arith.constant 1.280000e+02 : f32
    %18 = vector.broadcast %cst_10 : f32 to vector<16x1xf32>
    %19 = arith.divf %17, %18 : vector<16x1xf32>
    %20 = vector.broadcast %12 : vector<16x1xf32> to vector<16x128xf32>
    %21 = arith.subf %8, %20 : vector<16x128xf32>
    %cst_11 = arith.constant 9.99999996E-13 : f32
    %22 = vector.broadcast %cst_11 : f32 to vector<16x1xf32>
    %23 = arith.addf %19, %22 : vector<16x1xf32>
    %24 = math.rsqrt %23 : vector<16x1xf32>
    %25 = vector.broadcast %24 : vector<16x1xf32> to vector<16x128xf32>
    %26 = arith.mulf %21, %25 : vector<16x128xf32>
    %c0_12 = arith.constant 0 : index
    %c0_13 = arith.constant 0 : index
    %27 = vector.load %arg5[%c0_12, %c0_13] : memref<1x128xf32, #tpu.memory_space<vmem>>, vector<1x128xf32>
    %28 = vector.broadcast %27 : vector<1x128xf32> to vector<16x128xf32>
    %29 = arith.mulf %26, %28 : vector<16x128xf32>
    %c0_14 = arith.constant 0 : index
    %c0_15 = arith.constant 0 : index
    %30 = vector.load %arg6[%c0_14, %c0_15] : memref<1x128xf32, #tpu.memory_space<vmem>>, vector<1x128xf32>
    %31 = vector.broadcast %30 : vector<1x128xf32> to vector<16x128xf32>
    %32 = arith.addf %29, %31 : vector<16x128xf32>
    %33 = arith.truncf %32 : vector<16x128xf32> to vector<16x128xbf16>
    %c0_16 = arith.constant 0 : index
    %c0_17 = arith.constant 0 : index
    %34 = vector.load %arg7[%c0_16, %c0_17] : memref<16x128xbf16, #tpu.memory_space<vmem>>, vector<16x128xbf16>
    tpu.vector_store %arg7[%c0_16, %c0_17], %33 {strides = array<i32>} : memref<16x128xbf16, #tpu.memory_space<vmem>>, vector<16x128xbf16>,
    return
  }
  func.func @transform_0(%arg0: i32) -> (i32, i32) {
    %c0_i32 = arith.constant 0 : i32
    %c0_i32_0 = arith.constant 0 : i32
    return %arg0, %c0_i32 : i32, i32
  }
  func.func @transform_1(%arg0: i32) -> (i32, i32) {
    %c0_i32 = arith.constant 0 : i32
    %c0_i32_0 = arith.constant 0 : i32
    %c0_i32_1 = arith.constant 0 : i32
    return %c0_i32, %c0_i32_0 : i32, i32
  }
  func.func @transform_2(%arg0: i32) -> (i32, i32) {
    %c0_i32 = arith.constant 0 : i32
    %c0_i32_0 = arith.constant 0 : i32
    %c0_i32_1 = arith.constant 0 : i32
    return %c0_i32, %c0_i32_0 : i32, i32
  }
  func.func @transform_3(%arg0: i32) -> (i32, i32) {
    %c0_i32 = arith.constant 0 : i32
    %c0_i32_0 = arith.constant 0 : i32
    return %arg0, %c0_i32 : i32, i32
  }
  func.func @transform_4(%arg0: i32) -> (i32, i32) {
    %c0_i32 = arith.constant 0 : i32
    %c0_i32_0 = arith.constant 0 : i32
    %c0_i32_1 = arith.constant 0 : i32
    return %c0_i32, %c0_i32_0 : i32, i32
  }
  func.func @transform_5(%arg0: i32) -> (i32, i32) {
    %c0_i32 = arith.constant 0 : i32
    %c0_i32_0 = arith.constant 0 : i32
    %c0_i32_1 = arith.constant 0 : i32
    return %c0_i32, %c0_i32_0 : i32, i32
  }
  func.func @transform_6(%arg0: i32) -> (i32, i32) {
    %c0_i32 = arith.constant 0 : i32
    %c0_i32_0 = arith.constant 0 : i32
    return %arg0, %c0_i32 : i32, i32
  }
}

module attributes {stable_mosaic.version = 11 : i64} {
  func.func @_attn_kernel(%arg0: i32, %arg1: i32, %arg2: memref<1x8x128xbf16, #tpu.memory_space<vmem>>, %arg3: memref<1x8x128xbf16, #tpu.memory_space<vmem>>, %arg4: memref<1x8x128xbf16, #tpu.memory_space<vmem>>, %arg5: memref<1x1x8xf32, #tpu.memory_space<vmem>>, %arg6: memref<1x8x128xbf16, #tpu.memory_space<vmem>>, %arg7: memref<8x128xf32, #tpu.memory_space<vmem>>) attributes {dimension_semantics = [#tpu.dimension_semantics<parallel>, #tpu.dimension_semantics<parallel>], iteration_bounds = array<i64: 2, 1>, scalar_prefetch = 0 : i64, scratch_operands = 1 : i64, tpu.core_type = #tpu.core_type<tc>, window_params = [{transform_indices = @transform_0, window_bounds = array<i64: 1, 8, 128>}, {transform_indices = @transform_1, window_bounds = array<i64: 1, 8, 128>}, {transform_indices = @transform_2, window_bounds = array<i64: 1, 8, 128>}, {transform_indices = @transform_3, window_bounds = array<i64: 1, 1, 8>}, {transform_indices = @transform_4, window_bounds = array<i64: 1, 8, 128>}]} {
    %c0 = arith.constant 0 : index
    %c0_0 = arith.constant 0 : index
    %c0_1 = arith.constant 0 : index
    %0 = vector.load %arg2[%c0, %c0_0, %c0_1] : memref<1x8x128xbf16, #tpu.memory_space<vmem>>, vector<1x8x128xbf16>
    %1 = vector.shape_cast %0 : vector<1x8x128xbf16> to vector<8x128xbf16>
    %c0_2 = arith.constant 0 : index
    %c0_3 = arith.constant 0 : index
    %c0_4 = arith.constant 0 : index
    %2 = vector.load %arg3[%c0_2, %c0_3, %c0_4] : memref<1x8x128xbf16, #tpu.memory_space<vmem>>, vector<1x8x128xbf16>
    %3 = vector.shape_cast %2 : vector<1x8x128xbf16> to vector<8x128xbf16>
    %c0_5 = arith.constant 0 : index
    %c0_6 = arith.constant 0 : index
    %c0_7 = arith.constant 0 : index
    %4 = vector.load %arg4[%c0_5, %c0_6, %c0_7] : memref<1x8x128xbf16, #tpu.memory_space<vmem>>, vector<1x8x128xbf16>
    %5 = vector.shape_cast %4 : vector<1x8x128xbf16> to vector<8x128xbf16>
    %c0_8 = arith.constant 0 : index
    %c0_9 = arith.constant 0 : index
    %c0_10 = arith.constant 0 : index
    %6 = vector.load %arg5[%c0_8, %c0_9, %c0_10] : memref<1x1x8xf32, #tpu.memory_space<vmem>>, vector<1x1x8xf32>
    %7 = vector.shape_cast %6 : vector<1x1x8xf32> to vector<1x8xf32>
    %8 = vector.extract_strided_slice %1 {offsets = [0, 0], sizes = [8, 32], strides = [1, 1]} : vector<8x128xbf16> to vector<8x32xbf16>
    %9 = vector.extract_strided_slice %3 {offsets = [0, 0], sizes = [8, 32], strides = [1, 1]} : vector<8x128xbf16> to vector<8x32xbf16>
    %10 = vector.extract_strided_slice %5 {offsets = [0, 0], sizes = [8, 32], strides = [1, 1]} : vector<8x128xbf16> to vector<8x32xbf16>
    %cst = arith.constant dense<0.000000e+00> : vector<8x8xf32>
    %11 = tpu.matmul %8, %9, %cst {dimension_numbers = #tpu.dot_dimension_numbers<[1], [1], [0], [0], [0, 0, 1, 0], [], []>} : vector<8x32xbf16>, vector<8x32xbf16>, vector<8x8xf32> -> vector<8x8xf32>
    %12 = vector.broadcast %7 : vector<1x8xf32> to vector<8x8xf32>
    %13 = arith.addf %11, %12 : vector<8x8xf32>
    %cst_11 = arith.constant dense<0xFF800000> : vector<8xf32>
    %14 = vector.multi_reduction <maximumf>, %13, %cst_11 [1] : vector<8x8xf32> to vector<8xf32>
    %15 = vector.shape_cast %14 : vector<8xf32> to vector<8x1xf32>
    %16 = vector.broadcast %15 : vector<8x1xf32> to vector<8x8xf32>
    %17 = arith.subf %13, %16 : vector<8x8xf32>
    %18 = math.exp %17 : vector<8x8xf32>
    %cst_12 = arith.constant dense<0.000000e+00> : vector<8xf32>
    %19 = vector.multi_reduction <add>, %18, %cst_12 [1] : vector<8x8xf32> to vector<8xf32>
    %20 = vector.shape_cast %19 : vector<8xf32> to vector<8x1xf32>
    %21 = arith.truncf %18 : vector<8x8xf32> to vector<8x8xbf16>
    %cst_13 = arith.constant dense<0.000000e+00> : vector<8x32xf32>
    %22 = tpu.matmul %21, %10, %cst_13 {dimension_numbers = #tpu.dot_dimension_numbers<[1], [0], [0], [1], [0, 0, 1, 1], [], []>} : vector<8x8xbf16>, vector<8x32xbf16>, vector<8x32xf32> -> vector<8x32xf32>
    %23 = tpu.reciprocal %20 {approx = true} : vector<8x1xf32> -> vector<8x1xf32>
    %24 = vector.broadcast %23 : vector<8x1xf32> to vector<8x32xf32>
    %25 = arith.mulf %22, %24 : vector<8x32xf32>
    %c0_14 = arith.constant 0 : index
    %c0_15 = arith.constant 0 : index
    %26 = vector.load %arg7[%c0_14, %c0_15] : memref<8x128xf32, #tpu.memory_space<vmem>>, vector<8x32xf32>
    tpu.vector_store %arg7[%c0_14, %c0_15], %25 {strides = array<i32>} : memref<8x128xf32, #tpu.memory_space<vmem>>, vector<8x32xf32>,
    %27 = vector.extract_strided_slice %1 {offsets = [0, 32], sizes = [8, 32], strides = [1, 1]} : vector<8x128xbf16> to vector<8x32xbf16>
    %28 = vector.extract_strided_slice %3 {offsets = [0, 32], sizes = [8, 32], strides = [1, 1]} : vector<8x128xbf16> to vector<8x32xbf16>
    %29 = vector.extract_strided_slice %5 {offsets = [0, 32], sizes = [8, 32], strides = [1, 1]} : vector<8x128xbf16> to vector<8x32xbf16>
    %cst_16 = arith.constant dense<0.000000e+00> : vector<8x8xf32>
    %30 = tpu.matmul %27, %28, %cst_16 {dimension_numbers = #tpu.dot_dimension_numbers<[1], [1], [0], [0], [0, 0, 1, 0], [], []>} : vector<8x32xbf16>, vector<8x32xbf16>, vector<8x8xf32> -> vector<8x8xf32>
    %31 = vector.broadcast %7 : vector<1x8xf32> to vector<8x8xf32>
    %32 = arith.addf %30, %31 : vector<8x8xf32>
    %cst_17 = arith.constant dense<0xFF800000> : vector<8xf32>
    %33 = vector.multi_reduction <maximumf>, %32, %cst_17 [1] : vector<8x8xf32> to vector<8xf32>
    %34 = vector.shape_cast %33 : vector<8xf32> to vector<8x1xf32>
    %35 = vector.broadcast %34 : vector<8x1xf32> to vector<8x8xf32>
    %36 = arith.subf %32, %35 : vector<8x8xf32>
    %37 = math.exp %36 : vector<8x8xf32>
    %cst_18 = arith.constant dense<0.000000e+00> : vector<8xf32>
    %38 = vector.multi_reduction <add>, %37, %cst_18 [1] : vector<8x8xf32> to vector<8xf32>
    %39 = vector.shape_cast %38 : vector<8xf32> to vector<8x1xf32>
    %40 = arith.truncf %37 : vector<8x8xf32> to vector<8x8xbf16>
    %cst_19 = arith.constant dense<0.000000e+00> : vector<8x32xf32>
    %41 = tpu.matmul %40, %29, %cst_19 {dimension_numbers = #tpu.dot_dimension_numbers<[1], [0], [0], [1], [0, 0, 1, 1], [], []>} : vector<8x8xbf16>, vector<8x32xbf16>, vector<8x32xf32> -> vector<8x32xf32>
    %42 = tpu.reciprocal %39 {approx = true} : vector<8x1xf32> -> vector<8x1xf32>
    %43 = vector.broadcast %42 : vector<8x1xf32> to vector<8x32xf32>
    %44 = arith.mulf %41, %43 : vector<8x32xf32>
    %c0_20 = arith.constant 0 : index
    %c32 = arith.constant 32 : index
    %45 = vector.load %arg7[%c0_20, %c32] : memref<8x128xf32, #tpu.memory_space<vmem>>, vector<8x32xf32>
    tpu.vector_store %arg7[%c0_20, %c32], %44 {strides = array<i32>} : memref<8x128xf32, #tpu.memory_space<vmem>>, vector<8x32xf32>,
    %46 = vector.extract_strided_slice %1 {offsets = [0, 64], sizes = [8, 32], strides = [1, 1]} : vector<8x128xbf16> to vector<8x32xbf16>
    %47 = vector.extract_strided_slice %3 {offsets = [0, 64], sizes = [8, 32], strides = [1, 1]} : vector<8x128xbf16> to vector<8x32xbf16>
    %48 = vector.extract_strided_slice %5 {offsets = [0, 64], sizes = [8, 32], strides = [1, 1]} : vector<8x128xbf16> to vector<8x32xbf16>
    %cst_21 = arith.constant dense<0.000000e+00> : vector<8x8xf32>
    %49 = tpu.matmul %46, %47, %cst_21 {dimension_numbers = #tpu.dot_dimension_numbers<[1], [1], [0], [0], [0, 0, 1, 0], [], []>} : vector<8x32xbf16>, vector<8x32xbf16>, vector<8x8xf32> -> vector<8x8xf32>
    %50 = vector.broadcast %7 : vector<1x8xf32> to vector<8x8xf32>
    %51 = arith.addf %49, %50 : vector<8x8xf32>
    %cst_22 = arith.constant dense<0xFF800000> : vector<8xf32>
    %52 = vector.multi_reduction <maximumf>, %51, %cst_22 [1] : vector<8x8xf32> to vector<8xf32>
    %53 = vector.shape_cast %52 : vector<8xf32> to vector<8x1xf32>
    %54 = vector.broadcast %53 : vector<8x1xf32> to vector<8x8xf32>
    %55 = arith.subf %51, %54 : vector<8x8xf32>
    %56 = math.exp %55 : vector<8x8xf32>
    %cst_23 = arith.constant dense<0.000000e+00> : vector<8xf32>
    %57 = vector.multi_reduction <add>, %56, %cst_23 [1] : vector<8x8xf32> to vector<8xf32>
    %58 = vector.shape_cast %57 : vector<8xf32> to vector<8x1xf32>
    %59 = arith.truncf %56 : vector<8x8xf32> to vector<8x8xbf16>
    %cst_24 = arith.constant dense<0.000000e+00> : vector<8x32xf32>
    %60 = tpu.matmul %59, %48, %cst_24 {dimension_numbers = #tpu.dot_dimension_numbers<[1], [0], [0], [1], [0, 0, 1, 1], [], []>} : vector<8x8xbf16>, vector<8x32xbf16>, vector<8x32xf32> -> vector<8x32xf32>
    %61 = tpu.reciprocal %58 {approx = true} : vector<8x1xf32> -> vector<8x1xf32>
    %62 = vector.broadcast %61 : vector<8x1xf32> to vector<8x32xf32>
    %63 = arith.mulf %60, %62 : vector<8x32xf32>
    %c0_25 = arith.constant 0 : index
    %c64 = arith.constant 64 : index
    %64 = vector.load %arg7[%c0_25, %c64] : memref<8x128xf32, #tpu.memory_space<vmem>>, vector<8x32xf32>
    tpu.vector_store %arg7[%c0_25, %c64], %63 {strides = array<i32>} : memref<8x128xf32, #tpu.memory_space<vmem>>, vector<8x32xf32>,
    %65 = vector.extract_strided_slice %1 {offsets = [0, 96], sizes = [8, 32], strides = [1, 1]} : vector<8x128xbf16> to vector<8x32xbf16>
    %66 = vector.extract_strided_slice %3 {offsets = [0, 96], sizes = [8, 32], strides = [1, 1]} : vector<8x128xbf16> to vector<8x32xbf16>
    %67 = vector.extract_strided_slice %5 {offsets = [0, 96], sizes = [8, 32], strides = [1, 1]} : vector<8x128xbf16> to vector<8x32xbf16>
    %cst_26 = arith.constant dense<0.000000e+00> : vector<8x8xf32>
    %68 = tpu.matmul %65, %66, %cst_26 {dimension_numbers = #tpu.dot_dimension_numbers<[1], [1], [0], [0], [0, 0, 1, 0], [], []>} : vector<8x32xbf16>, vector<8x32xbf16>, vector<8x8xf32> -> vector<8x8xf32>
    %69 = vector.broadcast %7 : vector<1x8xf32> to vector<8x8xf32>
    %70 = arith.addf %68, %69 : vector<8x8xf32>
    %cst_27 = arith.constant dense<0xFF800000> : vector<8xf32>
    %71 = vector.multi_reduction <maximumf>, %70, %cst_27 [1] : vector<8x8xf32> to vector<8xf32>
    %72 = vector.shape_cast %71 : vector<8xf32> to vector<8x1xf32>
    %73 = vector.broadcast %72 : vector<8x1xf32> to vector<8x8xf32>
    %74 = arith.subf %70, %73 : vector<8x8xf32>
    %75 = math.exp %74 : vector<8x8xf32>
    %cst_28 = arith.constant dense<0.000000e+00> : vector<8xf32>
    %76 = vector.multi_reduction <add>, %75, %cst_28 [1] : vector<8x8xf32> to vector<8xf32>
    %77 = vector.shape_cast %76 : vector<8xf32> to vector<8x1xf32>
    %78 = arith.truncf %75 : vector<8x8xf32> to vector<8x8xbf16>
    %cst_29 = arith.constant dense<0.000000e+00> : vector<8x32xf32>
    %79 = tpu.matmul %78, %67, %cst_29 {dimension_numbers = #tpu.dot_dimension_numbers<[1], [0], [0], [1], [0, 0, 1, 1], [], []>} : vector<8x8xbf16>, vector<8x32xbf16>, vector<8x32xf32> -> vector<8x32xf32>
    %80 = tpu.reciprocal %77 {approx = true} : vector<8x1xf32> -> vector<8x1xf32>
    %81 = vector.broadcast %80 : vector<8x1xf32> to vector<8x32xf32>
    %82 = arith.mulf %79, %81 : vector<8x32xf32>
    %c0_30 = arith.constant 0 : index
    %c96 = arith.constant 96 : index
    %83 = vector.load %arg7[%c0_30, %c96] : memref<8x128xf32, #tpu.memory_space<vmem>>, vector<8x32xf32>
    tpu.vector_store %arg7[%c0_30, %c96], %82 {strides = array<i32>} : memref<8x128xf32, #tpu.memory_space<vmem>>, vector<8x32xf32>,
    %c0_31 = arith.constant 0 : index
    %c0_32 = arith.constant 0 : index
    %84 = vector.load %arg7[%c0_31, %c0_32] : memref<8x128xf32, #tpu.memory_space<vmem>>, vector<8x128xf32>
    %85 = arith.truncf %84 : vector<8x128xf32> to vector<8x128xbf16>
    %c0_33 = arith.constant 0 : index
    %c0_34 = arith.constant 0 : index
    %c0_35 = arith.constant 0 : index
    %86 = vector.load %arg6[%c0_33, %c0_34, %c0_35] : memref<1x8x128xbf16, #tpu.memory_space<vmem>>, vector<1x8x128xbf16>
    %87 = vector.shape_cast %86 : vector<1x8x128xbf16> to vector<8x128xbf16>
    %88 = vector.shape_cast %85 : vector<8x128xbf16> to vector<1x8x128xbf16>
    tpu.vector_store %arg6[%c0_33, %c0_34, %c0_35], %88 {strides = array<i32>} : memref<1x8x128xbf16, #tpu.memory_space<vmem>>, vector<1x8x128xbf16>,
    return
  }
  func.func @transform_0(%arg0: i32, %arg1: i32) -> (i32, i32, i32) {
    %c0_i32 = arith.constant 0 : i32
    %c0_i32_0 = arith.constant 0 : i32
    return %arg0, %arg1, %c0_i32 : i32, i32, i32
  }
  func.func @transform_1(%arg0: i32, %arg1: i32) -> (i32, i32, i32) {
    %c0_i32 = arith.constant 0 : i32
    %c1_i32 = arith.constant 1 : i32
    %c0_i32_0 = arith.constant 0 : i32
    return %arg0, %c0_i32, %c1_i32 : i32, i32, i32
  }
  func.func @transform_2(%arg0: i32, %arg1: i32) -> (i32, i32, i32) {
    %c0_i32 = arith.constant 0 : i32
    %c2_i32 = arith.constant 2 : i32
    %c0_i32_0 = arith.constant 0 : i32
    return %arg0, %c0_i32, %c2_i32 : i32, i32, i32
  }
  func.func @transform_3(%arg0: i32, %arg1: i32) -> (i32, i32, i32) {
    %c0_i32 = arith.constant 0 : i32
    %c0_i32_0 = arith.constant 0 : i32
    %c0_i32_1 = arith.constant 0 : i32
    return %arg0, %c0_i32, %c0_i32_0 : i32, i32, i32
  }
  func.func @transform_4(%arg0: i32, %arg1: i32) -> (i32, i32, i32) {
    %c0_i32 = arith.constant 0 : i32
    %c0_i32_0 = arith.constant 0 : i32
    return %arg0, %arg1, %c0_i32 : i32, i32, i32
  }
}

module attributes {stable_mosaic.version = 11 : i64} {
  func.func @_matmul_1k_kernel(%arg0: i32, %arg1: i32, %arg2: memref<16x128xbf16, #tpu.memory_space<vmem>>, %arg3: memref<128x512xbf16, #tpu.memory_space<vmem>>, %arg4: memref<1x512xf32, #tpu.memory_space<vmem>>, %arg5: memref<16x512xbf16, #tpu.memory_space<vmem>>) attributes {dimension_semantics = [#tpu.dimension_semantics<parallel>, #tpu.dimension_semantics<parallel>], iteration_bounds = array<i64: 1, 1>, scalar_prefetch = 0 : i64, scratch_operands = 0 : i64, tpu.core_type = #tpu.core_type<tc>, window_params = [{transform_indices = @transform_0, window_bounds = array<i64: 16, 128>}, {pipeline_mode = #tpu.pipeline_mode<synchronous>, transform_indices = @transform_1, window_bounds = array<i64: 128, 512>}, {pipeline_mode = #tpu.pipeline_mode<synchronous>, transform_indices = @transform_2, window_bounds = array<i64: 1, 512>}, {transform_indices = @transform_3, window_bounds = array<i64: 16, 512>}]} {
    %c0 = arith.constant 0 : index
    %c0_0 = arith.constant 0 : index
    %0 = vector.load %arg3[%c0, %c0_0] : memref<128x512xbf16, #tpu.memory_space<vmem>>, vector<128x512xbf16>
    %c0_1 = arith.constant 0 : index
    %c0_2 = arith.constant 0 : index
    %1 = vector.load %arg4[%c0_1, %c0_2] : memref<1x512xf32, #tpu.memory_space<vmem>>, vector<1x512xf32>
    %c0_3 = arith.constant 0 : index
    %c0_4 = arith.constant 0 : index
    %2 = vector.load %arg2[%c0_3, %c0_4] : memref<16x128xbf16, #tpu.memory_space<vmem>>, vector<16x128xbf16>
    %cst = arith.constant dense<0.000000e+00> : vector<16x512xf32>
    %3 = tpu.matmul %2, %0, %cst {dimension_numbers = #tpu.dot_dimension_numbers<[1], [0], [0], [1], [0, 0, 1, 1], [], []>} : vector<16x128xbf16>, vector<128x512xbf16>, vector<16x512xf32> -> vector<16x512xf32>
    %4 = vector.broadcast %1 : vector<1x512xf32> to vector<16x512xf32>
    %5 = arith.addf %3, %4 : vector<16x512xf32>
    %cst_5 = arith.constant 5.000000e-01 : f32
    %6 = vector.broadcast %cst_5 : f32 to vector<16x512xf32>
    %7 = arith.mulf %6, %5 : vector<16x512xf32>
    %cst_6 = arith.constant 4.471500e-02 : f32
    %8 = vector.broadcast %cst_6 : f32 to vector<16x512xf32>
    %9 = arith.mulf %8, %5 : vector<16x512xf32>
    %10 = arith.mulf %9, %5 : vector<16x512xf32>
    %11 = arith.mulf %10, %5 : vector<16x512xf32>
    %12 = arith.addf %5, %11 : vector<16x512xf32>
    %cst_7 = arith.constant 0.797884583 : f32
    %13 = vector.broadcast %cst_7 : f32 to vector<16x512xf32>
    %14 = arith.mulf %13, %12 : vector<16x512xf32>
    %15 = math.tanh %14 : vector<16x512xf32>
    %cst_8 = arith.constant 1.000000e+00 : f32
    %16 = vector.broadcast %cst_8 : f32 to vector<16x512xf32>
    %17 = arith.addf %16, %15 : vector<16x512xf32>
    %18 = arith.mulf %7, %17 : vector<16x512xf32>
    %19 = arith.truncf %18 : vector<16x512xf32> to vector<16x512xbf16>
    %c0_9 = arith.constant 0 : index
    %c0_10 = arith.constant 0 : index
    %20 = vector.load %arg5[%c0_9, %c0_10] : memref<16x512xbf16, #tpu.memory_space<vmem>>, vector<16x512xbf16>
    tpu.vector_store %arg5[%c0_9, %c0_10], %19 {strides = array<i32>} : memref<16x512xbf16, #tpu.memory_space<vmem>>, vector<16x512xbf16>,
    return
  }
  func.func @transform_0(%arg0: i32, %arg1: i32) -> (i32, i32) {
    %c0_i32 = arith.constant 0 : i32
    %c0_i32_0 = arith.constant 0 : i32
    return %arg0, %c0_i32 : i32, i32
  }
  func.func @transform_1(%arg0: i32, %arg1: i32) -> (i32, i32) {
    %c0_i32 = arith.constant 0 : i32
    %c0_i32_0 = arith.constant 0 : i32
    %c0_i32_1 = arith.constant 0 : i32
    return %c0_i32, %c0_i32_0 : i32, i32
  }
  func.func @transform_2(%arg0: i32, %arg1: i32) -> (i32, i32) {
    %c0_i32 = arith.constant 0 : i32
    %c0_i32_0 = arith.constant 0 : i32
    %c0_i32_1 = arith.constant 0 : i32
    return %c0_i32, %c0_i32_0 : i32, i32
  }
  func.func @transform_3(%arg0: i32, %arg1: i32) -> (i32, i32) {
    %c0_i32 = arith.constant 0 : i32
    return %arg0, %arg1 : i32, i32
  }
}

module attributes {stable_mosaic.version = 11 : i64} {
  func.func @_mm_res_ln_1k_kernel(%arg0: i32, %arg1: memref<16x512xbf16, #tpu.memory_space<vmem>>, %arg2: memref<512x128xbf16, #tpu.memory_space<vmem>>, %arg3: memref<1x128xf32, #tpu.memory_space<vmem>>, %arg4: memref<16x128xbf16, #tpu.memory_space<vmem>>, %arg5: memref<1x128xf32, #tpu.memory_space<vmem>>, %arg6: memref<1x128xf32, #tpu.memory_space<vmem>>, %arg7: memref<16x128xbf16, #tpu.memory_space<vmem>>) attributes {dimension_semantics = [#tpu.dimension_semantics<parallel>], iteration_bounds = array<i64: 1>, scalar_prefetch = 0 : i64, scratch_operands = 0 : i64, tpu.core_type = #tpu.core_type<tc>, window_params = [{transform_indices = @transform_0, window_bounds = array<i64: 16, 512>}, {pipeline_mode = #tpu.pipeline_mode<synchronous>, transform_indices = @transform_1, window_bounds = array<i64: 512, 128>}, {pipeline_mode = #tpu.pipeline_mode<synchronous>, transform_indices = @transform_2, window_bounds = array<i64: 1, 128>}, {transform_indices = @transform_3, window_bounds = array<i64: 16, 128>}, {pipeline_mode = #tpu.pipeline_mode<synchronous>, transform_indices = @transform_4, window_bounds = array<i64: 1, 128>}, {pipeline_mode = #tpu.pipeline_mode<synchronous>, transform_indices = @transform_5, window_bounds = array<i64: 1, 128>}, {transform_indices = @transform_6, window_bounds = array<i64: 16, 128>}]} {
    %c0 = arith.constant 0 : index
    %c0_0 = arith.constant 0 : index
    %0 = vector.load %arg1[%c0, %c0_0] : memref<16x512xbf16, #tpu.memory_space<vmem>>, vector<16x512xbf16>
    %c0_1 = arith.constant 0 : index
    %c0_2 = arith.constant 0 : index
    %1 = vector.load %arg2[%c0_1, %c0_2] : memref<512x128xbf16, #tpu.memory_space<vmem>>, vector<512x128xbf16>
    %cst = arith.constant dense<0.000000e+00> : vector<16x128xf32>
    %2 = tpu.matmul %0, %1, %cst {dimension_numbers = #tpu.dot_dimension_numbers<[1], [0], [0], [1], [0, 0, 1, 1], [], []>} : vector<16x512xbf16>, vector<512x128xbf16>, vector<16x128xf32> -> vector<16x128xf32>
    %c0_3 = arith.constant 0 : index
    %c0_4 = arith.constant 0 : index
    %3 = vector.load %arg3[%c0_3, %c0_4] : memref<1x128xf32, #tpu.memory_space<vmem>>, vector<1x128xf32>
    %4 = vector.broadcast %3 : vector<1x128xf32> to vector<16x128xf32>
    %5 = arith.addf %2, %4 : vector<16x128xf32>
    %c0_5 = arith.constant 0 : index
    %c0_6 = arith.constant 0 : index
    %6 = vector.load %arg4[%c0_5, %c0_6] : memref<16x128xbf16, #tpu.memory_space<vmem>>, vector<16x128xbf16>
    %7 = arith.extf %6 : vector<16x128xbf16> to vector<16x128xf32>
    %8 = arith.addf %5, %7 : vector<16x128xf32>
    %cst_7 = arith.constant dense<0.000000e+00> : vector<16xf32>
    %9 = vector.multi_reduction <add>, %8, %cst_7 [1] : vector<16x128xf32> to vector<16xf32>
    %10 = vector.shape_cast %9 : vector<16xf32> to vector<16x1xf32>
    %cst_8 = arith.constant 1.280000e+02 : f32
    %11 = vector.broadcast %cst_8 : f32 to vector<16x1xf32>
    %12 = arith.divf %10, %11 : vector<16x1xf32>
    %13 = vector.broadcast %12 : vector<16x1xf32> to vector<16x128xf32>
    %14 = arith.subf %8, %13 : vector<16x128xf32>
    %15 = arith.mulf %14, %14 : vector<16x128xf32>
    %cst_9 = arith.constant dense<0.000000e+00> : vector<16xf32>
    %16 = vector.multi_reduction <add>, %15, %cst_9 [1] : vector<16x128xf32> to vector<16xf32>
    %17 = vector.shape_cast %16 : vector<16xf32> to vector<16x1xf32>
    %cst_10 = arith.constant 1.280000e+02 : f32
    %18 = vector.broadcast %cst_10 : f32 to vector<16x1xf32>
    %19 = arith.divf %17, %18 : vector<16x1xf32>
    %20 = vector.broadcast %12 : vector<16x1xf32> to vector<16x128xf32>
    %21 = arith.subf %8, %20 : vector<16x128xf32>
    %cst_11 = arith.constant 9.99999996E-13 : f32
    %22 = vector.broadcast %cst_11 : f32 to vector<16x1xf32>
    %23 = arith.addf %19, %22 : vector<16x1xf32>
    %24 = math.rsqrt %23 : vector<16x1xf32>
    %25 = vector.broadcast %24 : vector<16x1xf32> to vector<16x128xf32>
    %26 = arith.mulf %21, %25 : vector<16x128xf32>
    %c0_12 = arith.constant 0 : index
    %c0_13 = arith.constant 0 : index
    %27 = vector.load %arg5[%c0_12, %c0_13] : memref<1x128xf32, #tpu.memory_space<vmem>>, vector<1x128xf32>
    %28 = vector.broadcast %27 : vector<1x128xf32> to vector<16x128xf32>
    %29 = arith.mulf %26, %28 : vector<16x128xf32>
    %c0_14 = arith.constant 0 : index
    %c0_15 = arith.constant 0 : index
    %30 = vector.load %arg6[%c0_14, %c0_15] : memref<1x128xf32, #tpu.memory_space<vmem>>, vector<1x128xf32>
    %31 = vector.broadcast %30 : vector<1x128xf32> to vector<16x128xf32>
    %32 = arith.addf %29, %31 : vector<16x128xf32>
    %33 = arith.truncf %32 : vector<16x128xf32> to vector<16x128xbf16>
    %c0_16 = arith.constant 0 : index
    %c0_17 = arith.constant 0 : index
    %34 = vector.load %arg7[%c0_16, %c0_17] : memref<16x128xbf16, #tpu.memory_space<vmem>>, vector<16x128xbf16>
    tpu.vector_store %arg7[%c0_16, %c0_17], %33 {strides = array<i32>} : memref<16x128xbf16, #tpu.memory_space<vmem>>, vector<16x128xbf16>,
    return
  }
  func.func @transform_0(%arg0: i32) -> (i32, i32) {
    %c0_i32 = arith.constant 0 : i32
    %c0_i32_0 = arith.constant 0 : i32
    return %arg0, %c0_i32 : i32, i32
  }
  func.func @transform_1(%arg0: i32) -> (i32, i32) {
    %c0_i32 = arith.constant 0 : i32
    %c0_i32_0 = arith.constant 0 : i32
    %c0_i32_1 = arith.constant 0 : i32
    return %c0_i32, %c0_i32_0 : i32, i32
  }
  func.func @transform_2(%arg0: i32) -> (i32, i32) {
    %c0_i32 = arith.constant 0 : i32
    %c0_i32_0 = arith.constant 0 : i32
    %c0_i32_1 = arith.constant 0 : i32
    return %c0_i32, %c0_i32_0 : i32, i32
  }
  func.func @transform_3(%arg0: i32) -> (i32, i32) {
    %c0_i32 = arith.constant 0 : i32
    %c0_i32_0 = arith.constant 0 : i32
    return %arg0, %c0_i32 : i32, i32
  }
  func.func @transform_4(%arg0: i32) -> (i32, i32) {
    %c0_i32 = arith.constant 0 : i32
    %c0_i32_0 = arith.constant 0 : i32
    %c0_i32_1 = arith.constant 0 : i32
    return %c0_i32, %c0_i32_0 : i32, i32
  }
  func.func @transform_5(%arg0: i32) -> (i32, i32) {
    %c0_i32 = arith.constant 0 : i32
    %c0_i32_0 = arith.constant 0 : i32
    %c0_i32_1 = arith.constant 0 : i32
    return %c0_i32, %c0_i32_0 : i32, i32
  }
  func.func @transform_6(%arg0: i32) -> (i32, i32) {
    %c0_i32 = arith.constant 0 : i32
    %c0_i32_0 = arith.constant 0 : i32
    return %arg0, %c0_i32 : i32, i32
  }
}

</mosaic_0001>

<bundles_post_ra>
// kernel: bert_base_uncased_forward.11
= control target key start
LH: loop header
LB: loop body
LE: loop exit
PB: predicated region body
PF: predicated region fallthrough
CT: control target
= control target key end

     0   :  { %s121_s0 = inlined_call_operand.vmem [shape: f32[16,128], index: 0, kind: input, shape index: {}]   ;;  %s122_s1 = inlined_call_operand.vmem [shape: f32[1,128], index: 1, kind: input, shape index: {}]   ;;  %s123_s2 = inlined_call_operand.vmem [shape: f32[1,128], index: 2, kind: input, shape index: {}]   ;;  %s124_s3 = inlined_call_operand.vmem [shape: bf16[16,128], index: 3, kind: output, shape index: {}]  }
   0x1   :  { %v14_v0 = vld [vmem:[%s121_s0] sm:$0xff]  ;;  %v15_v1 = vld [vmem:[%s121_s0 + $0x8] sm:$0xff] }
   0x2   :  { %16 = vadd.xlane.f32.xlu0 %v14_v0  ;;  %v71_v18 = vld [vmem:[%s122_s1] ss:$0 sm:$0xff] }
   0x3   :  { %v72_v22 = vld [vmem:[%s123_s2] ss:$0 sm:$0xff] }
   0x6   :  { %18 = vadd.xlane.f32.xlu0 %v15_v1 }
  0x8f   :  { %v17_v2 = vpop.xlane.xlu0 %16 }
  0x90   :  { %v21_v3 = vmul.f32 0.0078125, %v17_v2 }
  0x92   :  { %v23_v4 = vsub.f32 %v14_v0, %v21_v3 }
  0x93   :  { %v19_v5 = vpop.xlane.xlu0 %18 }
  0x94   :  { %v22_v6 = vmul.f32 0.0078125, %v19_v5  ;;  %v25_v7 = vmul.f32 %v23_v4, %v23_v4 }
  0x96   :  { %v24_v8 = vsub.f32 %v15_v1, %v22_v6  ;;  %27 = vadd.xlane.f32.xlu1 %v25_v7 }
  0x98   :  { %v26_v9 = vmul.f32 %v24_v8, %v24_v8 }
  0x9a   :  { %29 = vadd.xlane.f32.xlu1 %v26_v9 }
 0x123   :  { %v28_v10 = vpop.xlane.xlu1 %27 }
 0x124   :  { %v31_v11 = vmul.f32 0.0078125, %v28_v10 }
 0x126   :  { %v33_v12 = vadd.f32 1e-12, %v31_v11 }
 0x127   :  { %v30_v13 = vpop.xlane.xlu1 %29 }
 0x128   :  { %82 = vrsqrt.f32 %v33_v12  ;;  %v32_v14 = vmul.f32 0.0078125, %v30_v13 }
 0x12a   :  { %v34_v15 = vadd.f32 1e-12, %v32_v14 }
 0x12c   :  { %84 = vrsqrt.f32 %v34_v15 }
 0x132   :  { %v83_v16 = vpop.eup %82 }
 0x133   :  { %v37_v17 = vmul.f32 %v83_v16, %v23_v4 }
 0x135   :  { %v46_v20 = vmul.f32 %v71_v18, %v37_v17 }
 0x136   :  { %v85_v19 = vpop.eup %84 }
 0x137   :  { %v38_v21 = vmul.f32 %v85_v19, %v24_v8  ;;  %v55_v24 = vadd.f32 %v72_v22, %v46_v20 }
 0x139   :  { %v47_v23 = vmul.f32 %v71_v18, %v38_v21 }
 0x13b   :  { %v56_v25 = vadd.f32 %v72_v22, %v47_v23 }
 0x13d   :  { %v80_v26 = vpack.c.bf16 %v56_v25, %v55_v24 }
 0x13f   :  { %81 = vst [vmem:[%s124_s3] sm:$0xff] %v80_v26  }

// kernel: bert_base_uncased_forward.14
= control target key start
LH: loop header
LB: loop body
LE: loop exit
PB: predicated region body
PF: predicated region fallthrough
CT: control target
= control target key end

     0   :  { %v274_v0 = vmov 0.0   ;;  %vm275_vm0 = vmmov 0   ;;  %s353_s1 = inlined_call_operand.vmem [shape: bf16[128,128], index: 1, kind: input, shape index: {}]   ;;  %s354_s0 = inlined_call_operand.vmem [shape: bf16[16,128], index: 0, kind: input, shape index: {}]   ;;  %s355_s3 = inlined_call_operand.vmem [shape: bf16[16,128], index: 3, kind: input, shape index: {}]   ;;  %s356_s2 = inlined_call_operand.vmem [shape: f32[1,128], index: 2, kind: input, shape index: {}]   ;;  %s357_s4 = inlined_call_operand.vmem [shape: f32[1,128], index: 4, kind: input, shape index: {}]   ;;  %s358_s5 = inlined_call_operand.vmem [shape: f32[1,128], index: 5, kind: input, shape index: {}]   ;;  %s359_s6 = inlined_call_operand.vmem [shape: bf16[16,128], index: 6, kind: output, shape index: {}]  }
   0x1   :  { %239 = vmatprep.subr.bf16.mxu0 %v274_v0  ;;  %v261_v1 = vld [vmem:[%s353_s1] sm:$0xff]   ;;  %255 = vmatprep.mubr.msk.bf16.mxu0 %vm275_vm0, %v274_v0  ;;  %v262_v2 = vld [vmem:[%s353_s1 + $0x8] sm:$0xff]   ;;  %v263_v3 = vld [vmem:[%s353_s1 + $0x10] sm:$0xff]  }
   0x2   :  { %240 = vmatpush3.bf16.msra.mxu0 %v261_v1  ;;  %v264_v4 = vld [vmem:[%s353_s1 + $0x18] sm:$0xff]   ;;  %v265_v5 = vld [vmem:[%s353_s1 + $0x20] sm:$0xff]   ;;  %v266_v6 = vld [vmem:[%s353_s1 + $0x28] sm:$0xff]  }
   0x3   :  { %241 = vmatprep.subr.bf16.mxu0 %v274_v0  ;;  %v267_v7 = vld [vmem:[%s353_s1 + $0x30] sm:$0xff]   ;;  %v268_v8 = vld [vmem:[%s353_s1 + $0x38] sm:$0xff]   ;;  %v269_v9 = vld [vmem:[%s354_s0] sm:$0xff]  }
   0x4   :  { %v222_v10 = vld [vmem:[%s355_s3] sm:$0xff]  }
   0x5   :  { %v205_v11 = vld [vmem:[%s356_s2] ss:$0 sm:$0xff]  ;;  %v223_v12 = vunpack.c.l.bf16 %v222_v10  ;;  %v224_v20 = vunpack.c.h.bf16 %v222_v10 }
   0x6   :  { %242 = vmatpush3.bf16.msra.mxu0 %v262_v2  ;;  %v215_v38 = vld [vmem:[%s357_s4] ss:$0 sm:$0xff] }
   0x7   :  { %243 = vmatprep.subr.bf16.mxu0 %v274_v0  ;;  %v216_v42 = vld [vmem:[%s358_s5] ss:$0 sm:$0xff] }
   0xa   :  { %244 = vmatpush3.bf16.msra.mxu0 %v263_v3 }
   0xb   :  { %245 = vmatprep.subr.bf16.mxu0 %v274_v0 }
   0xe   :  { %246 = vmatpush3.bf16.msra.mxu0 %v264_v4 }
   0xf   :  { %247 = vmatprep.subr.bf16.mxu0 %v274_v0 }
  0x12   :  { %248 = vmatpush3.bf16.msra.mxu0 %v265_v5 }
  0x13   :  { %249 = vmatprep.subr.bf16.mxu0 %v274_v0 }
  0x16   :  { %250 = vmatpush3.bf16.msra.mxu0 %v266_v6 }
  0x17   :  { %251 = vmatprep.subr.bf16.mxu0 %v274_v0 }
  0x1a   :  { %252 = vmatpush3.bf16.msra.mxu0 %v267_v7 }
  0x1b   :  { %253 = vmatprep.subr.bf16.mxu0 %v274_v0 }
  0x1e   :  { %254 = vmatpush3.bf16.msra.mxu0 %v268_v8 }
  0x21   :  { %256 = vmatmul.mubr.bf16.vlgmr.msra.gmra.mrb[0].mxu0 %v269_v9 }
  0xf4   :  { %v137_v13 = vpop.f32.mrb[0].mxu0 }
  0xf5   :  { %v138_v14 = vadd.f32 %v205_v11, %v137_v13  ;;  %v257_v15 = vpop.f32.mrb[1].mxu0 }
  0xf6   :  { %v140_v16 = vpop.f32.mrb[2].mxu0 }
  0xf7   :  { %v141_v17 = vadd.f32 %v205_v11, %v140_v16  ;;  %v258_v18 = vpop.f32.mrb[3].mxu0  ;;  %v148_v19 = vadd.f32 %v223_v12, %v138_v14 }
  0xf9   :  { %150 = vadd.xlane.f32.xlu0 %v148_v19  ;;  %v149_v21 = vadd.f32 %v224_v20, %v141_v17 }
  0xfd   :  { %152 = vadd.xlane.f32.xlu0 %v149_v21 }
 0x186   :  { %v151_v22 = vpop.xlane.xlu0 %150 }
 0x187   :  { %v155_v23 = vmul.f32 0.0078125, %v151_v22 }
 0x189   :  { %v157_v24 = vsub.f32 %v148_v19, %v155_v23 }
 0x18a   :  { %v153_v25 = vpop.xlane.xlu0 %152 }
 0x18b   :  { %v156_v26 = vmul.f32 0.0078125, %v153_v25  ;;  %v159_v27 = vmul.f32 %v157_v24, %v157_v24 }
 0x18d   :  { %v158_v28 = vsub.f32 %v149_v21, %v156_v26  ;;  %161 = vadd.xlane.f32.xlu1 %v159_v27 }
 0x18f   :  { %v160_v29 = vmul.f32 %v158_v28, %v158_v28 }
 0x191   :  { %163 = vadd.xlane.f32.xlu1 %v160_v29 }
 0x21a   :  { %v162_v30 = vpop.xlane.xlu1 %161 }
 0x21b   :  { %v165_v31 = vmul.f32 0.0078125, %v162_v30 }
 0x21d   :  { %v167_v32 = vadd.f32 1e-12, %v165_v31 }
 0x21e   :  { %v164_v33 = vpop.xlane.xlu1 %163 }
 0x21f   :  { %270 = vrsqrt.f32 %v167_v32  ;;  %v166_v34 = vmul.f32 0.0078125, %v164_v33 }
 0x221   :  { %v168_v35 = vadd.f32 1e-12, %v166_v34 }
 0x223   :  { %272 = vrsqrt.f32 %v168_v35 }
 0x229   :  { %v271_v36 = vpop.eup %270 }
 0x22a   :  { %v171_v37 = vmul.f32 %v271_v36, %v157_v24 }
 0x22c   :  { %v180_v40 = vmul.f32 %v215_v38, %v171_v37 }
 0x22d   :  { %v273_v39 = vpop.eup %272 }
 0x22e   :  { %v172_v41 = vmul.f32 %v273_v39, %v158_v28  ;;  %v189_v44 = vadd.f32 %v216_v42, %v180_v40 }
 0x230   :  { %v181_v43 = vmul.f32 %v215_v38, %v172_v41 }
 0x232   :  { %v190_v45 = vadd.f32 %v216_v42, %v181_v43 }
 0x234   :  { %v228_v46 = vpack.c.bf16 %v190_v45, %v189_v44 }
 0x236   :  { %229 = vst [vmem:[%s359_s6] sm:$0xff] %v228_v46  }

// kernel: bert_base_uncased_forward.12
= control target key start
LH: loop header
LB: loop body
LE: loop exit
PB: predicated region body
PF: predicated region fallthrough
CT: control target
= control target key end

     0   :  { %v410_v0 = vmov 0.0   ;;  %vm411_vm0 = vmmov 0   ;;  %v412_v3 = vmov 0   ;;  %v51_v27 = vlaneseq  ;;  %s523_s1 = inlined_call_operand.vmem [shape: bf16[128,384], index: 1, kind: input, shape index: {}]   ;;  %s524_s0 = inlined_call_operand.vmem [shape: bf16[16,128], index: 0, kind: input, shape index: {}]   ;;  %s525_s2 = inlined_call_operand.vmem [shape: f32[1,384], index: 2, kind: input, shape index: {}]   ;;  %s526_s3 = inlined_call_operand.vmem [shape: bf16[16,384], index: 3, kind: output, shape index: {}]  }
   0x1   :  { %354 = vmatprep.subr.bf16.mxu1 %v410_v0  ;;  %v377_v1 = vld [vmem:[%s523_s1 + $0x4] ss:$12 sps:$4 sm:$0xff]   ;;  %370 = vmatprep.mubr.msk.bf16.mxu1 %vm411_vm0, %v410_v0  ;;  %v379_v2 = vld [vmem:[%s523_s1 + $0x8] ss:$12 sps:$4 sm:$0xff]   ;;  %v380_v4 = vld [vmem:[%s523_s1] ss:$12 sps:$4 sm:$0xff]  }
   0x2   :  { %232 = vmatprep.mubr.bf16.mxu0 %v412_v3  ;;  %200 = vmatprep.subr.bf16.mxu0 %v377_v1  ;;  %v381_v5 = vld [vmem:[%s523_s1 + $0x1c] ss:$12 sps:$4 sm:$0xff]   ;;  %v383_v6 = vld [vmem:[%s523_s1 + $0x20] ss:$12 sps:$4 sm:$0xff]   ;;  %v384_v7 = vld [vmem:[%s523_s1 + $0x18] ss:$12 sps:$4 sm:$0xff]  }
   0x3   :  { %355 = vmatpush3.bf16.msra.mxu1 %v379_v2  ;;  %201 = vmatpush1.bf16.msra.mxu0 %v380_v4  ;;  %v385_v8 = vld [vmem:[%s523_s1 + $0x34] ss:$12 sps:$4 sm:$0xff]   ;;  %v387_v9 = vld [vmem:[%s523_s1 + $0x38] ss:$12 sps:$4 sm:$0xff]   ;;  %v388_v10 = vld [vmem:[%s523_s1 + $0x30] ss:$12 sps:$4 sm:$0xff]  }
   0x4   :  { %356 = vmatprep.subr.bf16.mxu1 %v410_v0  ;;  %202 = vmatprep.subr.bf16.mxu0 %v381_v5  ;;  %v389_v11 = vld [vmem:[%s523_s1 + $0x4c] ss:$12 sps:$4 sm:$0xff]   ;;  %v391_v12 = vld [vmem:[%s523_s1 + $0x50] ss:$12 sps:$4 sm:$0xff]   ;;  %v392_v13 = vld [vmem:[%s523_s1 + $0x48] ss:$12 sps:$4 sm:$0xff]  }
   0x5   :  { %v393_v14 = vld [vmem:[%s523_s1 + $0x64] ss:$12 sps:$4 sm:$0xff]   ;;  %v395_v15 = vld [vmem:[%s523_s1 + $0x68] ss:$12 sps:$4 sm:$0xff]   ;;  %v396_v16 = vld [vmem:[%s523_s1 + $0x60] ss:$12 sps:$4 sm:$0xff]  }
   0x6   :  { %v397_v17 = vld [vmem:[%s523_s1 + $0x7c] ss:$12 sps:$4 sm:$0xff]   ;;  %v399_v18 = vld [vmem:[%s523_s1 + $0x80] ss:$12 sps:$4 sm:$0xff]   ;;  %v400_v19 = vld [vmem:[%s523_s1 + $0x78] ss:$12 sps:$4 sm:$0xff]  }
   0x7   :  { %357 = vmatpush3.bf16.msra.mxu1 %v383_v6  ;;  %203 = vmatpush1.bf16.msra.mxu0 %v384_v7  ;;  %v401_v20 = vld [vmem:[%s523_s1 + $0x94] ss:$12 sps:$4 sm:$0xff]   ;;  %v403_v21 = vld [vmem:[%s523_s1 + $0x98] ss:$12 sps:$4 sm:$0xff]   ;;  %v404_v22 = vld [vmem:[%s523_s1 + $0x90] ss:$12 sps:$4 sm:$0xff]  }
   0x8   :  { %358 = vmatprep.subr.bf16.mxu1 %v410_v0  ;;  %204 = vmatprep.subr.bf16.mxu0 %v385_v8  ;;  %v405_v23 = vld [vmem:[%s523_s1 + $0xac] ss:$12 sps:$4 sm:$0xff]   ;;  %v407_v24 = vld [vmem:[%s523_s1 + $0xb0] ss:$12 sps:$4 sm:$0xff]   ;;  %v408_v25 = vld [vmem:[%s523_s1 + $0xa8] ss:$12 sps:$4 sm:$0xff]  }
   0x9   :  { %v409_v26 = vld [vmem:[%s524_s0] sm:$0xff]   ;;  %v52_v28 = vshrl.u32 %v51_v27, 7 }
   0xa   :  { %v47_v30 = vld [vmem:[%s525_s2] sm:$0x7] }
   0xb   :  { %359 = vmatpush3.bf16.msra.mxu1 %v387_v9  ;;  %205 = vmatpush1.bf16.msra.mxu0 %v388_v10  ;;  %v61_v29 = vsub.s32 2, %v52_v28  ;;  %v53_v31 = vsub.s32 0, %v52_v28  ;;  %v57_v32 = vsub.s32 1, %v52_v28 }
   0xc   :  { %360 = vmatprep.subr.bf16.mxu1 %v410_v0  ;;  %206 = vmatprep.subr.bf16.mxu0 %v389_v11 }
   0xd   :  { %v62_v33 = vrot.slane %v47_v30, %v61_v29  ;;  %v54_v34 = vrot.slane %v47_v30, %v53_v31  ;;  %v58_v35 = vrot.slane %v47_v30, %v57_v32 }
   0xf   :  { %361 = vmatpush3.bf16.msra.mxu1 %v391_v12  ;;  %207 = vmatpush1.bf16.msra.mxu0 %v392_v13 }
  0x10   :  { %362 = vmatprep.subr.bf16.mxu1 %v410_v0  ;;  %208 = vmatprep.subr.bf16.mxu0 %v393_v14 }
  0x13   :  { %363 = vmatpush3.bf16.msra.mxu1 %v395_v15  ;;  %209 = vmatpush1.bf16.msra.mxu0 %v396_v16 }
  0x14   :  { %364 = vmatprep.subr.bf16.mxu1 %v410_v0  ;;  %210 = vmatprep.subr.bf16.mxu0 %v397_v17 }
  0x17   :  { %365 = vmatpush3.bf16.msra.mxu1 %v399_v18  ;;  %211 = vmatpush1.bf16.msra.mxu0 %v400_v19 }
  0x18   :  { %366 = vmatprep.subr.bf16.mxu1 %v410_v0  ;;  %212 = vmatprep.subr.bf16.mxu0 %v401_v20 }
  0x1b   :  { %367 = vmatpush3.bf16.msra.mxu1 %v403_v21  ;;  %213 = vmatpush1.bf16.msra.mxu0 %v404_v22 }
  0x1c   :  { %368 = vmatprep.subr.bf16.mxu1 %v410_v0  ;;  %214 = vmatprep.subr.bf16.mxu0 %v405_v23 }
  0x1f   :  { %369 = vmatpush3.bf16.msra.mxu1 %v407_v24  ;;  %215 = vmatpush1.bf16.msra.mxu0 %v408_v25 }
  0x22   :  { %371 = vmatmul.mubr.bf16.vlgmr.msra.gmra.mrb[0].mxu1 %v409_v26  ;;  %233 = vmatmul.mubr.bf16.vlgmr.msra.gmra.mrb[0].mxu0 %v409_v26 }
  0xf5   :  { %v277_v36 = vpop.f32.mrb[0].mxu1  ;;  %v234_v38 = vpop.f32.mrb[0].mxu0 }
  0xf6   :  { %v278_v37 = vadd.f32 %v277_v36, %v62_v33  ;;  %v372_v39 = vpop.f32.mrb[1].mxu1  ;;  %v235_v40 = vadd.f32 %v234_v38, %v54_v34  ;;  %v236_v41 = vpop.f32.mrb[1].mxu0 }
  0xf7   :  { %v280_v42 = vpop.f32.mrb[2].mxu1  ;;  %v237_v44 = vadd.f32 %v236_v41, %v58_v35  ;;  %v238_v46 = vpop.f32.mrb[2].mxu0 }
  0xf8   :  { %v342_v43 = vpack.c.bf16 %v278_v37, %v278_v37  ;;  %v281_v45 = vadd.f32 %v280_v42, %v62_v33  ;;  %v373_v47 = vpop.f32.mrb[3].mxu1  ;;  %v239_v48 = vadd.f32 %v238_v46, %v54_v34  ;;  %v240_v49 = vpop.f32.mrb[3].mxu0 }
  0xf9   :  { %v341_v50 = vpack.c.bf16 %v237_v44, %v235_v40  ;;  %v241_v52 = vadd.f32 %v240_v49, %v58_v35 }
  0xfa   :  { %305 = vst [vmem:[%s526_s3 + $0x8] sm:$0xf] %v342_v43  ;;  %v344_v51 = vpack.c.bf16 %v281_v45, %v281_v45 }
  0xfb   :  { %304 = vst [vmem:[%s526_s3] sm:$0xff] %v341_v50  ;;  %v343_v53 = vpack.c.bf16 %v241_v52, %v239_v48 }
  0xfc   :  { %307 = vst [vmem:[%s526_s3 + $0x14] sm:$0xf] %v344_v51 }
  0xfd   :  { %306 = vst [vmem:[%s526_s3 + $0xc] sm:$0xff] %v343_v53 }

// kernel: bert_base_uncased_forward.13
= control target key start
LH: loop header
LB: loop body
LE: loop exit
PB: predicated region body
PF: predicated region fallthrough
CT: control target
= control target key end

     0   :  { %s1086_s15 = smov 0   ;;  %s1088_s16 = smov 0   ;;  %s1213_s0 = inlined_call_operand.vmem [shape: bf16[2,8,384], index: 0, kind: input, shape index: {}, may-alias: {0,1,2}]   ;;  %s1214_s1 = inlined_call_operand.vmem [shape: bf16[2,8,384], index: 1, kind: input, shape index: {}, may-alias: {0,1,2}]   ;;  %s1215_s2 = inlined_call_operand.vmem [shape: bf16[2,8,384], index: 2, kind: input, shape index: {}, may-alias: {0,1,2}]   ;;  %s1216_s3 = inlined_call_operand.vmem [shape: f32[2,1,8], index: 3, kind: input, shape index: {}]   ;;  %s1217_s4 = inlined_call_operand.vmem [shape: bf16[2,8,128], index: 4, kind: output, shape index: {}]  }
   0x1   :  { %s1090_s17 = smov 0  }
   0x2 LB: > { %s26_s18 = sadd.s32 1, %s1050_s16  ;;  %p898_p0 = scmp.ge.s32.totalorder %s1054_s17, 1  ;;  %s1054_s17 = sphi %s1090_s17, %s14_s17   ;;  %s1050_s16 = sphi %s1088_s16, %s1219_s16   ;;  %s1046_s15 = sphi %s1086_s15, %s1218_s15  }
   0x3   : > { %p28_p1 = scmp.ge.s32.totalorder %s26_s18, 2  ;;  %p212_p2 = scmp.lt.s32.totalorder %s1054_s17, 3 }
   0x5   : > { %s1221_s18 = smov (%p28_p1, %s26_s18), 0  ;;  %p213_p3 = pnand %p898_p0, %p212_p2 }
   0x6   : > { %p259_p4 = scmp.lt.s32.totalorder (!%p213_p3), %s1046_s15, 1  ;;  %v1056_v0 = vmov (!%p213_p3), 0.0   ;;  %vm1057_vm0 = vmmov (!%p213_p3), 0   ;;  %vm301_vm1 = vcmask (!%p213_p3), 261120   ;;  %s1058_s26 = smov (!%p213_p3), 96   ;;  %vm348_vm2 = vcmask (!%p213_p3), 64512  }
   0x7   : > { %216 = sbr.rel (%p213_p3) target bundleno = 1176 (0x498), region = 36  ;;  %935 = vmatprep.subr.bf16.mxu0 (!%p213_p3), %v1056_v0  ;;  %937 = vmatprep.mubr.msk.bf16.mxu0 (!%p213_p3), %vm1057_vm0, %v1056_v0  ;;  %s1059_s27 = smov (!%p213_p3), 64   ;;  %vm362_vm3 = vcmask (!%p213_p3), 1043456   ;;  %vm532_vm4 = vcmask (!%p213_p3), 523520   ;;  %vm648_vm5 = vcmask (!%p213_p3), 785920   ;;  %vm764_vm6 = vcmask (!%p213_p3), 1048320  }
   0x8   : > { %941 = vmatprep.subr.bf16.mxu1 (!%p213_p3), %v1056_v0  ;;  %943 = vmatprep.mubr.msk.bf16.mxu1 (!%p213_p3), %vm1057_vm0, %v1056_v0  ;;  %s1060_s28 = smov (!%p213_p3), 32  }
   0xe   : > { %s1223_s15 = smov (!%p259_p4, %s1046_s15), 1 }
   0xf   : > { %s1113_s19 = smul.u32 12, %s1223_s15  ;;  %s282_s5 = scalar_lea.vmem %s1216_s3, %s1223_s15 }
  0x10   : > { %v1137_v6 = vld [vmem:[%s282_s5] ss:$0 sm:$0xff]  ;;  %s902_s9 = sshll.u32 %s1223_s15, 2 }
  0x11   : > { %s832_s22 = scalar_lea.vmem %s1214_s1, %s1113_s19  ;;  %s267_s25 = scalar_lea.vmem %s1213_s0, %s1113_s19 }
  0x12   : > { %v903_v1 = vld [vmem:[%s832_s22 + $0x4] sm:$0xf]  ;;  %v291_v3 = vld [vmem:[%s267_s25] sm:$0xf]  ;;  %s836_s8 = scalar_lea.vmem %s1215_s2, %s1113_s19  ;;  %s289_s12 = scalar_lea.vmem %s1217_s4, %s902_s9 }
  0x13   : > { %v306_v2 = vsel %vm301_vm1, %v903_v1, 0  ;;  %v908_v4 = vcombine.low %v291_v3, %v291_v3  ;;  %v909_v5 = vcombine.low %v903_v1, %v903_v1  ;;  %v904_v13 = vld [vmem:[%s836_s8 + $0x8] sm:$0xf] }
  0x14   : > { %936 = vmatpush3.bf16.xpose.msra.mxu0 %v306_v2  ;;  %v364_v14 = vsel %vm362_vm3, %v904_v13, 0  ;;  %v911_v46 = vcombine.low %v904_v13, %v904_v13 }
  0x15   : > { %953 = vmatprep.subr.bf16.mxu0 %v1056_v0  ;;  %412 = vrot.lane.b32.xlu1 %v908_v4, %s1058_s26 }
  0x16   : > { %942 = vmatpush3.bf16.msra.mxu1 %v364_v14 }
  0x17   : > { %947 = vmatprep.subr.bf16.mxu1 %v1056_v0 }
  0x19   : > { %536 = vrot.lane.b32.xlu1 %v909_v5, %s1059_s27 }
  0x1b   : > { %938 = vmatmul.mubr.msk.bf16.vlgmr.msra.gmra.mrb[0].mxu0 %vm301_vm1, %v291_v3 }
  0x1c   : > { %955 = vmatprep.mubr.msk.bf16.mxu0 %vm1057_vm0, %v1056_v0 }
  0x1d   : > { %534 = vrot.lane.b32.xlu1 %v908_v4, %s1059_s27 }
  0x21   : > { %652 = vrot.lane.b32.xlu1 %v909_v5, %s1060_s28 }
  0x25   : > { %650 = vrot.lane.b32.xlu1 %v908_v4, %s1060_s28 }
  0x87   : > { %v413_v20 = vpop.permute.xlu1 %412 }
  0x8b   : > { %v537_v23 = vpop.permute.xlu1 %536 }
  0x8c   : > { %v542_v24 = vsel %vm301_vm1, %v537_v23, 0 }
  0x8f   : > { %v535_v25 = vpop.permute.xlu1 %534 }
  0x93   : > { %v653_v26 = vpop.permute.xlu1 %652 }
  0x94   : > { %v658_v27 = vsel %vm301_vm1, %v653_v26, 0 }
  0x97   : > { %v651_v28 = vpop.permute.xlu1 %650 }
  0xee   : > { %v342_v7 = vpop.f32.mrb[0].mxu0 }
  0xef   : > { %v343_v8 = vadd.f32 %v1137_v6, %v342_v7  ;;  %v939_v9 = vpop.f32.mrb[1].mxu0 }
  0xf0   : > { %v345_v10 = vpop.f32.mrb[2].mxu0 }
  0xf1   : > { %v940_v11 = vpop.f32.mrb[3].mxu0  ;;  %v349_v12 = vsel %vm348_vm2, %v343_v8, -inf }
  0xf2   : > { %350 = vmax.xlane.f32.xlu0 %v349_v12 }
 0x108   : > { %417 = vrot.lane.b32.xlu0 %v909_v5, %s1058_s26 }
 0x17f   : > { %v351_v15 = vpop.xlane.xlu0 %350 }
 0x180   : > { %v352_v16 = vsub.f32 %v343_v8, %v351_v15 }
 0x182   : > { %v353_v17 = vmul.f32 1.442695, %v352_v16 }
 0x183   : > { %v418_v18 = vpop.permute.xlu0 %417 }
 0x184   : > { %1016 = vpow2.f32 %v353_v17  ;;  %v423_v21 = vsel %vm301_vm1, %v418_v18, 0 }
 0x18e   : > { %v1148_v19 = vpop.eup %1016 }
 0x18f   : > { %v358_v22 = vpack.c.bf16 %v1148_v19, %v1148_v19  ;;  %v355_v13 = vsel %vm348_vm2, %v1148_v19, 0.0 }
 0x191   : > { %944 = vmatmul.mubr.msk.bf16.vlgmr.msra.gmra.mrb[0].mxu1 %vm348_vm2, %v358_v22 }
 0x192   : > { %948 = vmatpush3.bf16.xpose.msra.mxu1 %v423_v21  ;;  %949 = vmatprep.mubr.msk.bf16.mxu1 %vm1057_vm0, %v1056_v0 }
 0x193   : > { %959 = vmatprep.subr.bf16.mxu1 %v1056_v0 }
 0x199   : > { %950 = vmatmul.mubr.msk.bf16.vlgmr.msra.gmra.mrb[4].mxu1 %vm301_vm1, %v413_v20 }
 0x19a   : > { %960 = vmatpush3.bf16.xpose.msra.mxu1 %v542_v24  ;;  %961 = vmatprep.mubr.msk.bf16.mxu1 %vm1057_vm0, %v1056_v0 }
 0x19b   : > { %971 = vmatprep.subr.bf16.mxu1 %v1056_v0 }
 0x1a1   : > { %962 = vmatmul.mubr.msk.bf16.vlgmr.msra.gmra.mrb[8].mxu1 %vm301_vm1, %v535_v25 }
 0x1a2   : > { %972 = vmatpush3.bf16.xpose.msra.mxu1 %v658_v27  ;;  %973 = vmatprep.mubr.msk.bf16.mxu1 %vm1057_vm0, %v1056_v0 }
 0x1a9   : > { %974 = vmatmul.mubr.msk.bf16.vlgmr.msra.gmra.mrb[12].mxu1 %vm301_vm1, %v651_v28 }
 0x264   : > { %v1167_v29 = vpop.f32.mrb[0].mxu1 }
 0x265   : > { %v945_v30 = vpop.f32.mrb[1].mxu1 }
 0x266   : > { %v403_v31 = vpop.f32.mrb[2].mxu1 }
 0x267   : > { %v946_v32 = vpop.f32.mrb[3].mxu1 }
 0x26c   : > { %v459_v33 = vpop.f32.mrb[4].mxu1 }
 0x26d   : > { %v460_v34 = vadd.f32 %v1137_v6, %v459_v33  ;;  %v951_v35 = vpop.f32.mrb[5].mxu1 }
 0x26e   : > { %v462_v36 = vpop.f32.mrb[6].mxu1 }
 0x26f   : > { %v952_v37 = vpop.f32.mrb[7].mxu1  ;;  %v465_v38 = vsel %vm348_vm2, %v460_v34, -inf }
 0x270   : > { %466 = vmax.xlane.f32.xlu1 %v465_v38 }
 0x274   : > { %v578_v39 = vpop.f32.mrb[8].mxu1 }
 0x275   : > { %v579_v40 = vadd.f32 %v1137_v6, %v578_v39  ;;  %v963_v41 = vpop.f32.mrb[9].mxu1 }
 0x276   : > { %v581_v42 = vpop.f32.mrb[10].mxu1 }
 0x277   : > { %v584_v43 = vsel %vm348_vm2, %v579_v40, -inf  ;;  %v964_v44 = vpop.f32.mrb[11].mxu1 }
 0x278   : > { %585 = vmax.xlane.f32.xlu0 %v584_v43 }
 0x27c   : > { %v694_v45 = vpop.f32.mrb[12].mxu1 }
 0x27d   : > { %v975_v47 = vpop.f32.mrb[13].mxu1  ;;  %v695_v50 = vadd.f32 %v1137_v6, %v694_v45 }
 0x27e   : > { %v697_v48 = vpop.f32.mrb[14].mxu1 }
 0x27f   : > { %v976_v49 = vpop.f32.mrb[15].mxu1  ;;  %v700_v51 = vsel %vm348_vm2, %v695_v50, -inf }
 0x281   : > { %594 = vrot.lane.b32.xlu1 %v911_v46, %s1059_s27 }
 0x28e   : > { %478 = vrot.lane.b32.xlu0 %v911_v46, %s1058_s26 }
 0x2a5   : > { %701 = vmax.xlane.f32.xlu1 %v700_v51 }
 0x2b6   : > { %710 = vrot.lane.b32.xlu1 %v911_v46, %s1060_s28 }
 0x2fd   : > { %v467_v52 = vpop.xlane.xlu1 %466 }
 0x2fe   : > { %v468_v53 = vsub.f32 %v460_v34, %v467_v52 }
 0x300   : > { %v469_v54 = vmul.f32 1.442695, %v468_v53 }
 0x301   : > { %v595_v61 = vpop.permute.xlu1 %594 }
 0x302   : > { %1018 = vpow2.f32 %v469_v54  ;;  %v600_v1 = vsel %vm362_vm3, %v595_v61, 0 }
 0x305   : > { %v586_v55 = vpop.xlane.xlu0 %585 }
 0x306   : > { %v587_v56 = vsub.f32 %v579_v40, %v586_v55 }
 0x308   : > { %v588_v57 = vmul.f32 1.442695, %v587_v56 }
 0x309   : > { %v479_v58 = vpop.permute.xlu0 %478 }
 0x30a   : > { %1020 = vpow2.f32 %v588_v57  ;;  %v484_v59 = vsel %vm362_vm3, %v479_v58, 0 }
 0x30b   : > { %954 = vmatpush3.bf16.msra.mxu0 %v484_v59 }
 0x30c   : > { %v1019_v60 = vpop.eup %1018  ;;  %965 = vmatprep.subr.bf16.mxu0 %v1056_v0 }
 0x30d   : > { %v471_v62 = vsel %vm348_vm2, %v1019_v60, 0.0  ;;  %v474_v63 = vpack.c.bf16 %v1019_v60, %v1019_v60 }
 0x30e   : > { %472 = vadd.xlane.f32.xlu0 %v471_v62 }
 0x30f   : > { %956 = vmatmul.mubr.msk.bf16.vlgmr.msra.gmra.mrb[4].mxu0 %vm348_vm2, %v474_v63 }
 0x310   : > { %966 = vmatpush3.bf16.msra.mxu0 %v600_v1  ;;  %967 = vmatprep.mubr.msk.bf16.mxu0 %vm1057_vm0, %v1056_v0 }
 0x311   : > { %977 = vmatprep.subr.bf16.mxu0 %v1056_v0 }
 0x314   : > { %v1021_v2 = vpop.eup %1020 }
 0x315   : > { %v590_v3 = vsel %vm348_vm2, %v1021_v2, 0.0  ;;  %v593_v4 = vpack.c.bf16 %v1021_v2, %v1021_v2 }
 0x316   : > { %591 = vadd.xlane.f32.xlu1 %v590_v3 }
 0x317   : > { %968 = vmatmul.mubr.msk.bf16.vlgmr.msra.gmra.mrb[8].mxu0 %vm348_vm2, %v593_v4 }
 0x318   : > { %979 = vmatprep.mubr.msk.bf16.mxu0 %vm1057_vm0, %v1056_v0 }
 0x332   : > { %v702_v5 = vpop.xlane.xlu1 %701 }
 0x333   : > { %v703_v6 = vsub.f32 %v695_v50, %v702_v5 }
 0x335   : > { %v704_v7 = vmul.f32 1.442695, %v703_v6 }
 0x336   : > { %v711_v8 = vpop.permute.xlu1 %710 }
 0x337   : > { %1022 = vpow2.f32 %v704_v7  ;;  %v716_v9 = vsel %vm362_vm3, %v711_v8, 0 }
 0x338   : > { %978 = vmatpush3.bf16.msra.mxu0 %v716_v9 }
 0x341   : > { %v1023_v10 = vpop.eup %1022 }
 0x342   : > { %v706_v11 = vsel %vm348_vm2, %v1023_v10, 0.0  ;;  %v709_v12 = vpack.c.bf16 %v1023_v10, %v1023_v10 }
 0x343   : > { %707 = vadd.xlane.f32.xlu0 %v706_v11 }
 0x344   : > { %980 = vmatmul.mubr.msk.bf16.vlgmr.msra.gmra.mrb[12].mxu0 %vm348_vm2, %v709_v12 }
 0x347   : > { %356 = vadd.xlane.f32.xlu0 %v355_v13 }
 0x39b   : > { %v473_v0 = vpop.xlane.xlu0 %472 }
 0x3a3   : > { %v592_v16 = vpop.xlane.xlu1 %591 }
 0x3d0   : > { %v708_v14 = vpop.xlane.xlu0 %707 }
 0x3d4   : > { %v357_v15 = vpop.xlane.xlu0 %356 }
 0x3d5   : > { %1024 = vrcp.f32 %v357_v15 }
 0x3d6   : > { %1026 = vrcp.f32 %v473_v0 }
 0x3d7   : > { %1028 = vrcp.f32 %v592_v16 }
 0x3d8   : > { %1030 = vrcp.f32 %v708_v14 }
 0x3df   : > { %v1025_v17 = vpop.eup %1024 }
 0x3e0   : > { %v407_v18 = vmul.f32 %v1025_v17, %v1167_v29  ;;  %v1027_v20 = vpop.eup %1026 }
 0x3e1   : > { %v1029_v25 = vpop.eup %1028 }
 0x3e2   : > { %v520_v21 = vpop.f32.mrb[4].mxu0  ;;  %408 = vst.msk [vmem:[#allocation2] sm:$0xff] %vm301_vm1, %v407_v18  ;;  %v1031_v29 = vpop.eup %1030 }
 0x3e3   : > { %v527_v22 = vmul.f32 %v1027_v20, %v520_v21  ;;  %v957_v23 = vpop.f32.mrb[5].mxu0 }
 0x3e4   : > { %v523_v24 = vpop.f32.mrb[6].mxu0 }
 0x3e5   : > { %529 = vrot.lane.b32.xlu1 %v527_v22, %s1060_s28  ;;  %v958_v19 = vpop.f32.mrb[7].mxu0 }
 0x3ea   : > { %v636_v26 = vpop.f32.mrb[8].mxu0 }
 0x3eb   : > { %v643_v27 = vmul.f32 %v1029_v25, %v636_v26  ;;  %v969_v28 = vpop.f32.mrb[9].mxu0 }
 0x3ec   : > { %v639_v30 = vpop.f32.mrb[10].mxu0 }
 0x3ed   : > { %645 = vrot.lane.b32.xlu0 %v643_v27, %s1059_s27  ;;  %v970_v31 = vpop.f32.mrb[11].mxu0 }
 0x417   : > { %v752_v32 = vpop.f32.mrb[12].mxu0 }
 0x418   : > { %v759_v33 = vmul.f32 %v1031_v29, %v752_v32  ;;  %v981_v34 = vpop.f32.mrb[13].mxu0 }
 0x419   : > { %v755_v35 = vpop.f32.mrb[14].mxu0 }
 0x41a   : > { %761 = vrot.lane.b32.xlu1 %v759_v33, %s1058_s26  ;;  %v982_v36 = vpop.f32.mrb[15].mxu0 }
 0x457   : > { %v530_v37 = vpop.permute.xlu1 %529 }
 0x458   : > { %533 = vst.msk [vmem:[#allocation2] sm:$0xff] %vm532_vm4, %v530_v37 }
 0x45f   : > { %v646_v38 = vpop.permute.xlu0 %645 }
 0x460   : > { %649 = vst.msk [vmem:[#allocation2] sm:$0xff] %vm648_vm5, %v646_v38 }
 0x48c   : > { %v762_v39 = vpop.permute.xlu1 %761 }
 0x48d   : > { %765 = vst.msk [vmem:[#allocation2] sm:$0xff] %vm764_vm6, %v762_v39 }
 0x494   : > { %v766_v40 = vld [vmem:[#allocation2] sm:$0xff] }
 0x495   : > { %v767_v41 = vpack.c.bf16 %v766_v40, %v766_v40 }
 0x497   : > { %768 = vst [vmem:[%s289_s12] sm:$0xf] %v767_v41 }
 0x498 PF: > { %s14_s17 = sadd.s32 1, %s1054_s17   ;;  %s1218_s15 = smov %s1050_s16 }
 0x499   : > { %p11_p5 = scmp.ge.s32.totalorder %s14_s17, 4   ;;  %s1219_s16 = smov %s1221_s18 }
 0x49b   :  { %13 = sbr.rel (!%p11_p5) target bundleno = 2 (0x2), region = 75 }

// kernel: bert_base_uncased_forward.15
= control target key start
LH: loop header
LB: loop body
LE: loop exit
PB: predicated region body
PF: predicated region fallthrough
CT: control target
= control target key end

     0   :  { %v534_v1 = vmov 0   ;;  %v51_v34 = vlaneseq  ;;  %s725_s1 = inlined_call_operand.vmem [shape: bf16[128,512], index: 1, kind: input, shape index: {}]   ;;  %s726_s0 = inlined_call_operand.vmem [shape: bf16[16,128], index: 0, kind: input, shape index: {}]   ;;  %s727_s2 = inlined_call_operand.vmem [shape: f32[1,512], index: 2, kind: input, shape index: {}]   ;;  %s728_s3 = inlined_call_operand.vmem [shape: bf16[16,512], index: 3, kind: output, shape index: {}]  }
   0x1   :  { %v469_v0 = vld [vmem:[%s725_s1 + $0x4] ss:$16 sps:$4 sm:$0xff]   ;;  %269 = vmatprep.mubr.bf16.mxu0 %v534_v1  ;;  %312 = vmatprep.mubr.bf16.mxu1 %v534_v1  ;;  %v471_v2 = vld [vmem:[%s725_s1 + $0xc] ss:$16 sps:$4 sm:$0xff]   ;;  %v473_v3 = vld [vmem:[%s725_s1] ss:$16 sps:$4 sm:$0xff]  }
   0x2   :  { %237 = vmatprep.subr.bf16.mxu0 %v469_v0  ;;  %v474_v4 = vld [vmem:[%s725_s1 + $0x8] ss:$16 sps:$4 sm:$0xff]   ;;  %280 = vmatprep.subr.bf16.mxu1 %v471_v2  ;;  %v475_v5 = vld [vmem:[%s725_s1 + $0x24] ss:$16 sps:$4 sm:$0xff]   ;;  %v477_v6 = vld [vmem:[%s725_s1 + $0x2c] ss:$16 sps:$4 sm:$0xff]  }
   0x3   :  { %238 = vmatpush1.bf16.msra.mxu0 %v473_v3  ;;  %281 = vmatpush1.bf16.msra.mxu1 %v474_v4  ;;  %v479_v7 = vld [vmem:[%s725_s1 + $0x20] ss:$16 sps:$4 sm:$0xff]   ;;  %v480_v8 = vld [vmem:[%s725_s1 + $0x28] ss:$16 sps:$4 sm:$0xff]   ;;  %v481_v9 = vld [vmem:[%s725_s1 + $0x44] ss:$16 sps:$4 sm:$0xff]  }
   0x4   :  { %239 = vmatprep.subr.bf16.mxu0 %v475_v5  ;;  %282 = vmatprep.subr.bf16.mxu1 %v477_v6  ;;  %v483_v10 = vld [vmem:[%s725_s1 + $0x4c] ss:$16 sps:$4 sm:$0xff]   ;;  %v485_v11 = vld [vmem:[%s725_s1 + $0x40] ss:$16 sps:$4 sm:$0xff]   ;;  %v486_v12 = vld [vmem:[%s725_s1 + $0x48] ss:$16 sps:$4 sm:$0xff]  }
   0x5   :  { %v487_v13 = vld [vmem:[%s725_s1 + $0x64] ss:$16 sps:$4 sm:$0xff]   ;;  %v489_v14 = vld [vmem:[%s725_s1 + $0x6c] ss:$16 sps:$4 sm:$0xff]   ;;  %v491_v15 = vld [vmem:[%s725_s1 + $0x60] ss:$16 sps:$4 sm:$0xff]  }
   0x6   :  { %v492_v16 = vld [vmem:[%s725_s1 + $0x68] ss:$16 sps:$4 sm:$0xff]   ;;  %v493_v17 = vld [vmem:[%s725_s1 + $0x84] ss:$16 sps:$4 sm:$0xff]   ;;  %v495_v18 = vld [vmem:[%s725_s1 + $0x8c] ss:$16 sps:$4 sm:$0xff]  }
   0x7   :  { %240 = vmatpush1.bf16.msra.mxu0 %v479_v7  ;;  %283 = vmatpush1.bf16.msra.mxu1 %v480_v8  ;;  %v497_v19 = vld [vmem:[%s725_s1 + $0x80] ss:$16 sps:$4 sm:$0xff]   ;;  %v498_v20 = vld [vmem:[%s725_s1 + $0x88] ss:$16 sps:$4 sm:$0xff]   ;;  %v499_v21 = vld [vmem:[%s725_s1 + $0xa4] ss:$16 sps:$4 sm:$0xff]  }
   0x8   :  { %241 = vmatprep.subr.bf16.mxu0 %v481_v9  ;;  %284 = vmatprep.subr.bf16.mxu1 %v483_v10  ;;  %v501_v22 = vld [vmem:[%s725_s1 + $0xac] ss:$16 sps:$4 sm:$0xff]   ;;  %v503_v23 = vld [vmem:[%s725_s1 + $0xa0] ss:$16 sps:$4 sm:$0xff]   ;;  %v504_v24 = vld [vmem:[%s725_s1 + $0xa8] ss:$16 sps:$4 sm:$0xff]  }
   0x9   :  { %v505_v25 = vld [vmem:[%s725_s1 + $0xc4] ss:$16 sps:$4 sm:$0xff]   ;;  %v507_v26 = vld [vmem:[%s725_s1 + $0xcc] ss:$16 sps:$4 sm:$0xff]   ;;  %v509_v27 = vld [vmem:[%s725_s1 + $0xc0] ss:$16 sps:$4 sm:$0xff]  }
   0xa   :  { %v510_v28 = vld [vmem:[%s725_s1 + $0xc8] ss:$16 sps:$4 sm:$0xff]   ;;  %v511_v29 = vld [vmem:[%s725_s1 + $0xe4] ss:$16 sps:$4 sm:$0xff]   ;;  %v513_v30 = vld [vmem:[%s725_s1 + $0xec] ss:$16 sps:$4 sm:$0xff]  }
   0xb   :  { %242 = vmatpush1.bf16.msra.mxu0 %v485_v11  ;;  %285 = vmatpush1.bf16.msra.mxu1 %v486_v12  ;;  %v515_v31 = vld [vmem:[%s725_s1 + $0xe0] ss:$16 sps:$4 sm:$0xff]   ;;  %v516_v32 = vld [vmem:[%s725_s1 + $0xe8] ss:$16 sps:$4 sm:$0xff]   ;;  %v52_v35 = vshrl.u32 %v51_v34, 7 }
   0xc   :  { %243 = vmatprep.subr.bf16.mxu0 %v487_v13  ;;  %286 = vmatprep.subr.bf16.mxu1 %v489_v14  ;;  %v517_v33 = vld [vmem:[%s726_s0] sm:$0xff]  }
   0xd   :  { %v53_v36 = vsub.s32 0, %v52_v35  ;;  %v61_v37 = vsub.s32 2, %v52_v35  ;;  %v47_v38 = vld [vmem:[%s727_s2] sm:$0xf]  ;;  %v57_v39 = vsub.s32 1, %v52_v35  ;;  %v65_v40 = vsub.s32 3, %v52_v35 }
   0xf   :  { %244 = vmatpush1.bf16.msra.mxu0 %v491_v15  ;;  %287 = vmatpush1.bf16.msra.mxu1 %v492_v16  ;;  %v54_v41 = vrot.slane %v47_v38, %v53_v36  ;;  %v62_v42 = vrot.slane %v47_v38, %v61_v37  ;;  %v58_v43 = vrot.slane %v47_v38, %v57_v39 }
  0x10   :  { %245 = vmatprep.subr.bf16.mxu0 %v493_v17  ;;  %288 = vmatprep.subr.bf16.mxu1 %v495_v18  ;;  %v66_v44 = vrot.slane %v47_v38, %v65_v40 }
  0x13   :  { %246 = vmatpush1.bf16.msra.mxu0 %v497_v19  ;;  %289 = vmatpush1.bf16.msra.mxu1 %v498_v20 }
  0x14   :  { %247 = vmatprep.subr.bf16.mxu0 %v499_v21  ;;  %290 = vmatprep.subr.bf16.mxu1 %v501_v22 }
  0x17   :  { %248 = vmatpush1.bf16.msra.mxu0 %v503_v23  ;;  %291 = vmatpush1.bf16.msra.mxu1 %v504_v24 }
  0x18   :  { %249 = vmatprep.subr.bf16.mxu0 %v505_v25  ;;  %292 = vmatprep.subr.bf16.mxu1 %v507_v26 }
  0x1b   :  { %250 = vmatpush1.bf16.msra.mxu0 %v509_v27  ;;  %293 = vmatpush1.bf16.msra.mxu1 %v510_v28 }
  0x1c   :  { %251 = vmatprep.subr.bf16.mxu0 %v511_v29  ;;  %294 = vmatprep.subr.bf16.mxu1 %v513_v30 }
  0x1f   :  { %252 = vmatpush1.bf16.msra.mxu0 %v515_v31  ;;  %295 = vmatpush1.bf16.msra.mxu1 %v516_v32 }
  0x22   :  { %270 = vmatmul.mubr.bf16.vlgmr.msra.gmra.mrb[0].mxu0 %v517_v33  ;;  %313 = vmatmul.mubr.bf16.vlgmr.msra.gmra.mrb[0].mxu1 %v517_v33 }
  0xf5   :  { %v271_v45 = vpop.f32.mrb[0].mxu0  ;;  %v314_v46 = vpop.f32.mrb[0].mxu1 }
  0xf6   :  { %v657_v47 = vadd.f32 %v271_v45, %v54_v41  ;;  %v659_v48 = vadd.f32 %v314_v46, %v62_v42  ;;  %v273_v49 = vpop.f32.mrb[1].mxu0  ;;  %v316_v50 = vpop.f32.mrb[1].mxu1 }
  0xf7   :  { %v661_v51 = vadd.f32 %v273_v49, %v58_v43  ;;  %v663_v52 = vadd.f32 %v316_v50, %v66_v44  ;;  %v275_v53 = vpop.f32.mrb[2].mxu0  ;;  %v318_v54 = vpop.f32.mrb[2].mxu1 }
  0xf8   :  { %v331_v55 = vmul.f32 0.044715, %v657_v47  ;;  %v333_v56 = vmul.f32 0.044715, %v659_v48  ;;  %v671_v61 = vadd.f32 %v275_v53, %v54_v41  ;;  %v673_v62 = vadd.f32 %v318_v54, %v62_v42  ;;  %v277_v63 = vpop.f32.mrb[3].mxu0  ;;  %v320_v0 = vpop.f32.mrb[3].mxu1 }
  0xf9   :  { %v332_v57 = vmul.f32 0.044715, %v661_v51  ;;  %v334_v58 = vmul.f32 0.044715, %v663_v52  ;;  %v677_v3 = vadd.f32 %v277_v63, %v58_v43  ;;  %v688_v13 = vadd.f32 %v320_v0, %v66_v44 }
  0xfa   :  { %v339_v59 = vmul.f32 %v331_v55, %v657_v47  ;;  %v341_v60 = vmul.f32 %v333_v56, %v659_v48  ;;  %v335_v6 = vmul.f32 0.044715, %v671_v61  ;;  %v337_v9 = vmul.f32 0.044715, %v673_v62 }
  0xfb   :  { %v340_v1 = vmul.f32 %v332_v57, %v661_v51  ;;  %v342_v2 = vmul.f32 %v334_v58, %v663_v52  ;;  %v336_v17 = vmul.f32 0.044715, %v677_v3  ;;  %v338_v26 = vmul.f32 0.044715, %v688_v13 }
  0xfc   :  { %v347_v4 = vmul.f32 %v339_v59, %v657_v47  ;;  %v349_v5 = vmul.f32 %v341_v60, %v659_v48  ;;  %v343_v12 = vmul.f32 %v335_v6, %v671_v61  ;;  %v345_v16 = vmul.f32 %v337_v9, %v673_v62 }
  0xfd   :  { %v348_v7 = vmul.f32 %v340_v1, %v661_v51  ;;  %v350_v8 = vmul.f32 %v342_v2, %v663_v52  ;;  %v344_v24 = vmul.f32 %v336_v17, %v677_v3  ;;  %v346_v30 = vmul.f32 %v338_v26, %v688_v13 }
  0xfe   :  { %v355_v10 = vadd.f32 %v347_v4, %v657_v47  ;;  %v357_v11 = vadd.f32 %v349_v5, %v659_v48  ;;  %v351_v20 = vmul.f32 %v343_v12, %v671_v61  ;;  %v353_v23 = vmul.f32 %v345_v16, %v673_v62 }
  0xff   :  { %v356_v14 = vadd.f32 %v348_v7, %v661_v51  ;;  %v358_v15 = vadd.f32 %v350_v8, %v663_v52  ;;  %v352_v28 = vmul.f32 %v344_v24, %v677_v3  ;;  %v354_v33 = vmul.f32 %v346_v30, %v688_v13 }
 0x100   :  { %v363_v18 = vmul.f32 0.7978846, %v355_v10  ;;  %v365_v19 = vmul.f32 0.7978846, %v357_v11  ;;  %v359_v25 = vadd.f32 %v351_v20, %v671_v61  ;;  %v361_v27 = vadd.f32 %v353_v23, %v673_v62 }
 0x101   :  { %v364_v21 = vmul.f32 0.7978846, %v356_v14  ;;  %v366_v22 = vmul.f32 0.7978846, %v358_v15  ;;  %v360_v32 = vadd.f32 %v352_v28, %v677_v3  ;;  %v362_v35 = vadd.f32 %v354_v33, %v688_v13 }
 0x102   :  { %518 = vtanh.f32 %v363_v18  ;;  %v367_v29 = vmul.f32 0.7978846, %v359_v25  ;;  %v369_v31 = vmul.f32 0.7978846, %v361_v27  ;;  %v323_v39 = vmul.f32 0.5, %v657_v47 }
 0x103   :  { %520 = vtanh.f32 %v365_v19  ;;  %v368_v34 = vmul.f32 0.7978846, %v360_v32  ;;  %v370_v36 = vmul.f32 0.7978846, %v362_v35  ;;  %v325_v42 = vmul.f32 0.5, %v659_v48 }
 0x104   :  { %522 = vtanh.f32 %v364_v21  ;;  %v324_v46 = vmul.f32 0.5, %v661_v51  ;;  %v326_v54 = vmul.f32 0.5, %v663_v52  ;;  %v327_v47 = vmul.f32 0.5, %v671_v61 }
 0x105   :  { %524 = vtanh.f32 %v366_v22  ;;  %v328_v2 = vmul.f32 0.5, %v677_v3  ;;  %v329_v52 = vmul.f32 0.5, %v673_v62  ;;  %v330_v6 = vmul.f32 0.5, %v688_v13 }
 0x106   :  { %526 = vtanh.f32 %v367_v29 }
 0x107   :  { %528 = vtanh.f32 %v369_v31 }
 0x108   :  { %530 = vtanh.f32 %v368_v34 }
 0x109   :  { %532 = vtanh.f32 %v370_v36 }
 0x10c   :  { %v519_v37 = vpop.eup %518 }
 0x10d   :  { %v521_v38 = vpop.eup %520  ;;  %v379_v40 = vadd.f32 1.0, %v519_v37 }
 0x10e   :  { %v523_v41 = vpop.eup %522  ;;  %v381_v43 = vadd.f32 1.0, %v521_v38 }
 0x10f   :  { %v525_v44 = vpop.eup %524  ;;  %v387_v45 = vmul.f32 %v379_v40, %v323_v39  ;;  %v380_v49 = vadd.f32 1.0, %v523_v41 }
 0x110   :  { %v527_v50 = vpop.eup %526  ;;  %v389_v53 = vmul.f32 %v381_v43, %v325_v42  ;;  %v382_v55 = vadd.f32 1.0, %v525_v44 }
 0x111   :  { %v529_v56 = vpop.eup %528  ;;  %v388_v57 = vmul.f32 %v380_v49, %v324_v46  ;;  %v383_v58 = vadd.f32 1.0, %v527_v50 }
 0x112   :  { %v390_v59 = vmul.f32 %v382_v55, %v326_v54  ;;  %v531_v60 = vpop.eup %530  ;;  %v385_v48 = vadd.f32 1.0, %v529_v56 }
 0x113   :  { %v464_v63 = vpack.c.bf16 %v388_v57, %v387_v45  ;;  %v391_v1 = vmul.f32 %v383_v58, %v327_v47  ;;  %v384_v51 = vadd.f32 1.0, %v531_v60  ;;  %v533_v4 = vpop.eup %532 }
 0x114   :  { %v465_v0 = vpack.c.bf16 %v390_v59, %v389_v53  ;;  %v393_v5 = vmul.f32 %v385_v48, %v329_v52  ;;  %v386_v7 = vadd.f32 1.0, %v533_v4 }
 0x115   :  { %419 = vst [vmem:[%s728_s3] sm:$0xff] %v464_v63  ;;  %v392_v61 = vmul.f32 %v384_v51, %v328_v2 }
 0x116   :  { %420 = vst [vmem:[%s728_s3 + $0x8] sm:$0xff] %v465_v0  ;;  %v394_v9 = vmul.f32 %v386_v7, %v330_v6 }
 0x117   :  { %v466_v8 = vpack.c.bf16 %v392_v61, %v391_v1 }
 0x118   :  { %v467_v3 = vpack.c.bf16 %v394_v9, %v393_v5 }
 0x119   :  { %421 = vst [vmem:[%s728_s3 + $0x10] sm:$0xff] %v466_v8 }
 0x11a   :  { %422 = vst [vmem:[%s728_s3 + $0x18] sm:$0xff] %v467_v3 }

// kernel: bert_base_uncased_forward.16
= control target key start
LH: loop header
LB: loop body
LE: loop exit
PB: predicated region body
PF: predicated region fallthrough
CT: control target
= control target key end

     0   :  { %s750_s1 = inlined_call_operand.vmem [shape: bf16[512,128], index: 1, kind: input, shape index: {}]   ;;  %s751_s0 = inlined_call_operand.vmem [shape: bf16[16,512], index: 0, kind: input, shape index: {}]   ;;  %s752_s2 = inlined_call_operand.vmem [shape: f32[1,128], index: 2, kind: input, shape index: {}]   ;;  %s753_s3 = inlined_call_operand.vmem [shape: bf16[16,128], index: 3, kind: input, shape index: {}]   ;;  %s754_s4 = inlined_call_operand.vmem [shape: f32[1,128], index: 4, kind: input, shape index: {}]   ;;  %s755_s5 = inlined_call_operand.vmem [shape: f32[1,128], index: 5, kind: input, shape index: {}]   ;;  %s756_s6 = inlined_call_operand.vmem [shape: bf16[16,128], index: 6, kind: output, shape index: {}]  }
   0x1   :  { %v550_v0 = vld [vmem:[%s750_s1 + $0x40] sm:$0xff]   ;;  %v554_v4 = vld [vmem:[%s750_s1 + $0x48] sm:$0xff]   ;;  %v558_v8 = vld [vmem:[%s750_s1 + $0x50] sm:$0xff]  }
   0x2   :  { %v551_v1 = vld [vmem:[%s750_s1 + $0xc0] sm:$0xff]   ;;  %506 = vmatprep.subr.bf16.mxu0 %v550_v0  ;;  %v555_v5 = vld [vmem:[%s750_s1 + $0xc8] sm:$0xff]   ;;  %v559_v9 = vld [vmem:[%s750_s1 + $0xd0] sm:$0xff]  }
   0x3   :  { %v552_v2 = vld [vmem:[%s750_s1] sm:$0xff]   ;;  %528 = vmatprep.subr.bf16.mxu1 %v551_v1  ;;  %v556_v6 = vld [vmem:[%s750_s1 + $0x8] sm:$0xff]   ;;  %v560_v10 = vld [vmem:[%s750_s1 + $0x10] sm:$0xff]  }
   0x4   :  { %v553_v3 = vld [vmem:[%s750_s1 + $0x80] sm:$0xff]   ;;  %507 = vmatpush3.bf16.msra.mxu0 %v552_v2  ;;  %v557_v7 = vld [vmem:[%s750_s1 + $0x88] sm:$0xff]   ;;  %v561_v11 = vld [vmem:[%s750_s1 + $0x90] sm:$0xff]  }
   0x5   :  { %529 = vmatpush3.bf16.msra.mxu1 %v553_v3  ;;  %508 = vmatprep.subr.bf16.mxu0 %v554_v4  ;;  %v562_v12 = vld [vmem:[%s750_s1 + $0x58] sm:$0xff]   ;;  %v566_v16 = vld [vmem:[%s750_s1 + $0x60] sm:$0xff]   ;;  %v570_v20 = vld [vmem:[%s750_s1 + $0x68] sm:$0xff]  }
   0x6   :  { %530 = vmatprep.subr.bf16.mxu1 %v555_v5  ;;  %v563_v13 = vld [vmem:[%s750_s1 + $0xd8] sm:$0xff]   ;;  %v567_v17 = vld [vmem:[%s750_s1 + $0xe0] sm:$0xff]   ;;  %v571_v21 = vld [vmem:[%s750_s1 + $0xe8] sm:$0xff]  }
   0x7   :  { %v564_v14 = vld [vmem:[%s750_s1 + $0x18] sm:$0xff]   ;;  %v568_v18 = vld [vmem:[%s750_s1 + $0x20] sm:$0xff]   ;;  %v572_v22 = vld [vmem:[%s750_s1 + $0x28] sm:$0xff]  }
   0x8   :  { %509 = vmatpush3.bf16.msra.mxu0 %v556_v6  ;;  %v565_v15 = vld [vmem:[%s750_s1 + $0x98] sm:$0xff]   ;;  %v569_v19 = vld [vmem:[%s750_s1 + $0xa0] sm:$0xff]   ;;  %v573_v23 = vld [vmem:[%s750_s1 + $0xa8] sm:$0xff]  }
   0x9   :  { %531 = vmatpush3.bf16.msra.mxu1 %v557_v7  ;;  %510 = vmatprep.subr.bf16.mxu0 %v558_v8  ;;  %v574_v24 = vld [vmem:[%s750_s1 + $0x70] sm:$0xff]   ;;  %v578_v28 = vld [vmem:[%s750_s1 + $0x78] sm:$0xff]   ;;  %v454_v38 = vld [vmem:[%s752_s2] ss:$0 sm:$0xff] }
   0xa   :  { %532 = vmatprep.subr.bf16.mxu1 %v559_v9  ;;  %v575_v25 = vld [vmem:[%s750_s1 + $0xf0] sm:$0xff]   ;;  %v579_v29 = vld [vmem:[%s750_s1 + $0xf8] sm:$0xff]   ;;  %v498_v40 = vld [vmem:[%s753_s3] sm:$0xff]  }
   0xb   :  { %v576_v26 = vld [vmem:[%s750_s1 + $0x30] sm:$0xff]   ;;  %v580_v30 = vld [vmem:[%s750_s1 + $0x38] sm:$0xff]   ;;  %v499_v50 = vunpack.c.l.bf16 %v498_v40  ;;  %v500_v56 = vunpack.c.h.bf16 %v498_v40 }
   0xc   :  { %511 = vmatpush3.bf16.msra.mxu0 %v560_v10  ;;  %v577_v27 = vld [vmem:[%s750_s1 + $0xb0] sm:$0xff]   ;;  %v581_v31 = vld [vmem:[%s750_s1 + $0xb8] sm:$0xff]   ;;  %v491_v10 = vld [vmem:[%s754_s4] ss:$0 sm:$0xff] }
   0xd   :  { %533 = vmatpush3.bf16.msra.mxu1 %v561_v11  ;;  %512 = vmatprep.subr.bf16.mxu0 %v562_v12  ;;  %v582_v32 = vld [vmem:[%s751_s0] ss:$16 sps:$4 sm:$0xff]   ;;  %v584_v33 = vld [vmem:[%s751_s0 + $0x4] ss:$16 sps:$4 sm:$0xff]   ;;  %v585_v34 = vld [vmem:[%s751_s0 + $0x8] ss:$16 sps:$4 sm:$0xff]  }
   0xe   :  { %534 = vmatprep.subr.bf16.mxu1 %v563_v13  ;;  %v587_v35 = vld [vmem:[%s751_s0 + $0xc] ss:$16 sps:$4 sm:$0xff]   ;;  %343 = vmatprep.mubr.bf16.mxu0 %v584_v33 }
   0xf   :  { %384 = vmatprep.mubr.bf16.mxu1 %v587_v35 }
  0x10   :  { %513 = vmatpush3.bf16.msra.mxu0 %v564_v14  ;;  %v492_v14 = vld [vmem:[%s755_s5] ss:$0 sm:$0xff] }
  0x11   :  { %535 = vmatpush3.bf16.msra.mxu1 %v565_v15  ;;  %514 = vmatprep.subr.bf16.mxu0 %v566_v16 }
  0x12   :  { %536 = vmatprep.subr.bf16.mxu1 %v567_v17 }
  0x14   :  { %515 = vmatpush3.bf16.msra.mxu0 %v568_v18 }
  0x15   :  { %537 = vmatpush3.bf16.msra.mxu1 %v569_v19  ;;  %516 = vmatprep.subr.bf16.mxu0 %v570_v20 }
  0x16   :  { %538 = vmatprep.subr.bf16.mxu1 %v571_v21 }
  0x18   :  { %517 = vmatpush3.bf16.msra.mxu0 %v572_v22 }
  0x19   :  { %539 = vmatpush3.bf16.msra.mxu1 %v573_v23  ;;  %518 = vmatprep.subr.bf16.mxu0 %v574_v24 }
  0x1a   :  { %540 = vmatprep.subr.bf16.mxu1 %v575_v25 }
  0x1c   :  { %519 = vmatpush3.bf16.msra.mxu0 %v576_v26 }
  0x1d   :  { %541 = vmatpush3.bf16.msra.mxu1 %v577_v27  ;;  %520 = vmatprep.subr.bf16.mxu0 %v578_v28 }
  0x1e   :  { %542 = vmatprep.subr.bf16.mxu1 %v579_v29 }
  0x20   :  { %521 = vmatpush3.bf16.msra.mxu0 %v580_v30 }
  0x21   :  { %543 = vmatpush3.bf16.msra.mxu1 %v581_v31 }
  0x23   :  { %344 = vmatmul.mubr.bf16.vlgmr.msra.gmra.mrb[0].mxu0 %v582_v32 }
  0x24   :  { %385 = vmatmul.mubr.bf16.vlgmr.msra.gmra.mrb[0].mxu1 %v585_v34 }
  0xf6   :  { %v522_v36 = vpop.f32.mrb[0].mxu0 }
  0xf7   :  { %v544_v37 = vpop.f32.mrb[0].mxu1  ;;  %v523_v39 = vpop.f32.mrb[1].mxu0 }
  0xf8   :  { %v524_v41 = vadd.f32 %v523_v39, %v522_v36  ;;  %v545_v42 = vpop.f32.mrb[1].mxu1  ;;  %v525_v43 = vpop.f32.mrb[2].mxu0 }
  0xf9   :  { %v546_v44 = vadd.f32 %v545_v42, %v544_v37  ;;  %v547_v45 = vpop.f32.mrb[2].mxu1  ;;  %v526_v46 = vpop.f32.mrb[3].mxu0 }
  0xfa   :  { %v346_v47 = vadd.f32 %v524_v41, %v454_v38  ;;  %v527_v48 = vadd.f32 %v526_v46, %v525_v43  ;;  %v548_v49 = vpop.f32.mrb[3].mxu1 }
  0xfb   :  { %v549_v51 = vadd.f32 %v548_v49, %v547_v45 }
  0xfc   :  { %v387_v52 = vadd.f32 %v546_v44, %v346_v47  ;;  %v349_v53 = vadd.f32 %v527_v48, %v454_v38 }
  0xfe   :  { %v390_v54 = vadd.f32 %v549_v51, %v349_v53  ;;  %v397_v55 = vadd.f32 %v499_v50, %v387_v52 }
 0x100   :  { %399 = vadd.xlane.f32.xlu0 %v397_v55  ;;  %v398_v57 = vadd.f32 %v500_v56, %v390_v54 }
 0x104   :  { %401 = vadd.xlane.f32.xlu0 %v398_v57 }
 0x18d   :  { %v400_v58 = vpop.xlane.xlu0 %399 }
 0x18e   :  { %v404_v59 = vmul.f32 0.0078125, %v400_v58 }
 0x190   :  { %v406_v60 = vsub.f32 %v397_v55, %v404_v59 }
 0x191   :  { %v402_v61 = vpop.xlane.xlu0 %401 }
 0x192   :  { %v405_v62 = vmul.f32 0.0078125, %v402_v61  ;;  %v408_v63 = vmul.f32 %v406_v60, %v406_v60 }
 0x194   :  { %v407_v0 = vsub.f32 %v398_v57, %v405_v62  ;;  %410 = vadd.xlane.f32.xlu1 %v408_v63 }
 0x196   :  { %v409_v1 = vmul.f32 %v407_v0, %v407_v0 }
 0x198   :  { %412 = vadd.xlane.f32.xlu1 %v409_v1 }
 0x221   :  { %v411_v2 = vpop.xlane.xlu1 %410 }
 0x222   :  { %v414_v3 = vmul.f32 0.0078125, %v411_v2 }
 0x224   :  { %v416_v4 = vadd.f32 1e-12, %v414_v3 }
 0x225   :  { %v413_v5 = vpop.xlane.xlu1 %412 }
 0x226   :  { %588 = vrsqrt.f32 %v416_v4  ;;  %v415_v6 = vmul.f32 0.0078125, %v413_v5 }
 0x228   :  { %v417_v7 = vadd.f32 1e-12, %v415_v6 }
 0x22a   :  { %590 = vrsqrt.f32 %v417_v7 }
 0x230   :  { %v589_v8 = vpop.eup %588 }
 0x231   :  { %v420_v9 = vmul.f32 %v589_v8, %v406_v60 }
 0x233   :  { %v429_v12 = vmul.f32 %v491_v10, %v420_v9 }
 0x234   :  { %v591_v11 = vpop.eup %590 }
 0x235   :  { %v421_v13 = vmul.f32 %v591_v11, %v407_v0  ;;  %v438_v16 = vadd.f32 %v492_v14, %v429_v12 }
 0x237   :  { %v430_v15 = vmul.f32 %v491_v10, %v421_v13 }
 0x239   :  { %v439_v17 = vadd.f32 %v492_v14, %v430_v15 }
 0x23b   :  { %v504_v18 = vpack.c.bf16 %v439_v17, %v438_v16 }
 0x23d   :  { %505 = vst [vmem:[%s756_s6] sm:$0xff] %v504_v18  }

</bundles_post_ra>
